<compile_context>
chip_gen: v7x
topology: tpu7x:2x2x1
jax: 0.10.0
libtpu: 0.0.40
codegen_flags: <defaults>
</compile_context>

<pallas_src>
import numpy as np
import jax
import jax.numpy as jnp
from jax.experimental import pallas as pl
from jax.experimental.pallas import tpu as pltpu


def _bilinear_matrix(in_size: int, out_size: int) -> np.ndarray:
    """Row-interpolation matrix matching nn.Upsample(mode='bilinear',
    align_corners=False) (PyTorch default when align_corners is unspecified)."""
    scale = in_size / out_size
    m = np.zeros((out_size, in_size), dtype=np.float32)
    for p in range(out_size):
        src = (p + 0.5) * scale - 0.5
        if src < 0.0:
            src = 0.0
        i0 = min(int(np.floor(src)), in_size - 1)
        i1 = i0 + 1 if i0 < in_size - 1 else i0
        l1 = src - i0
        m[p, i0] += 1.0 - l1
        m[p, i1] += l1
    return m


def _build_upsample_tap_mats(H: int, W: int, K: int) -> np.ndarray:
    """(K+2)^2 matrices B[(s+1)*(K+2)+(r+1)] of shape (H*W, H*W) such that

        (X_flat @ B[t])[c, i*W + j] = UP_zeropad[c, i*K + s, j*K + r],
        s, r in {-1, ..., K}

    where UP is the bilinearly K-upsampled image and UP_zeropad is UP with the
    conv's 1-pixel zero padding.  All boundary clamping / padding lives here
    (host-side numpy), not in the kernel."""
    mh = _bilinear_matrix(H, H * K)          # (H*K, H)
    mw = _bilinear_matrix(W, W * K)          # (W*K, W)

    def ext_rows(m, size, s):
        # R[i, h] = m[i*K + s, h] if the upsampled index is in range else 0
        r = np.zeros((size, size), np.float32)
        for i in range(size):
            y = i * K + s
            if 0 <= y < size * K:
                r[i] = m[y]
        return r

    mats = []
    for s in range(-1, K + 1):
        rh = ext_rows(mh, H, s)              # (H, H)
        for r in range(-1, K + 1):
            rw = ext_rows(mw, W, r)          # (W, W)
            # B[h*W+w, i*W+j] = rh[i, h] * rw[j, w]
            mats.append(np.kron(rh, rw).T)   # (H*W, H*W)
    return np.stack(mats, axis=0)            # ((K+2)^2, H*W, H*W)


def upblock_forward(x, wconv, bias, ksize):
    N, C, H, W = x.shape
    O = wconv.shape[0]
    K = int(ksize)
    HW = H * W
    KE = K + 2
    NEXT = KE * KE                 # number of extended upsample tap planes
    KK = K * K                     # pooling phases
    Cp = ((C + 7) // 8) * 8        # channels padded to a full sublane tile
    NCp = N * Cp                   # stage-1 matmul M (batch folded)
    NO = N * O                     # output rows (batch folded)
    D2 = NEXT * NCp                # stage-2 contraction depth (=256 here)

    # ---------- host-side constants ----------
    # Upsample/tap/phase matrices (dominant HBM transfer) in bf16.
    bmats = jnp.asarray(_build_upsample_tap_mats(H, W, K), dtype=jnp.bfloat16)

    # Zero-padded per-phase conv weights: row = kk*(N*O) + n*O + o,
    # col = t*(N*Cp) + n*Cp + c; nonzero only for this image's 9 tap blocks.
    w_np = np.asarray(wconv, np.float32)                      # (O, C, 3, 3)
    wbig = np.zeros((KK * NO, D2), np.float32)
    for p in range(K):
        for q in range(K):
            kk = p * K + q
            for dy in range(3):
                for dx in range(3):
                    t = (p + dy) * KE + (q + dx)
                    for n in range(N):
                        row0 = kk * NO + n * O
                        col0 = t * NCp + n * Cp
                        wbig[row0:row0 + O, col0:col0 + C] += w_np[:, :, dy, dx]
    wbig = jnp.asarray(wbig)                                   # (KK*NO, D2) f32

    # Per-output-row bias column: row n*O + o -> bias[o].
    bias_col = jnp.tile(bias.astype(jnp.float32), (N,)).reshape(NO, 1)

    # Channel-padded, batch-folded, lane-dense input (N*Cp, HW) in bf16.
    x_flat = x.astype(jnp.float32).reshape(N, C, HW)
    xp = jnp.pad(x_flat, ((0, 0), (0, Cp - C), (0, 0)))
    xp = xp.reshape(NCp, HW).astype(jnp.bfloat16)

    # ---------- kernel ----------
    def kernel(xp_ref, b_ref, w_ref, bias_ref, out_ref, ep_ref):
        # xp_ref:   (NCp, HW)       bf16   padded channels, batch folded into M
        # b_ref:    (NEXT, HW, HW)  bf16   upsample/tap/phase matrices
        # w_ref:    (KK*NO, D2)     f32    zero-padded per-phase conv weights
        # bias_ref: (NO, 1)         f32
        # out_ref:  (NO, HW)        f32
        # ep_ref:   (D2, HW)        f32    scratch: all tap planes, all images

        # Stage 1: bilinear upsample tap planes, one MXU matmul per tap,
        # written directly at aligned 16-row offsets (no im2col copies).
        for t in range(NEXT):
            ep_ref[t * NCp:(t + 1) * NCp, :] = jnp.dot(
                xp_ref[...], b_ref[t], preferred_element_type=jnp.float32)

        # Stage 2: conv3x3 for every pooling phase, output channel and image
        # in ONE matmul over the clean D2-deep contraction.
        z = jnp.dot(w_ref[...], ep_ref[...],
                    preferred_element_type=jnp.float32)        # (KK*NO, HW)

        # MaxPool over the KK phase row-groups, then bias + ReLU once
        # (valid because max commutes with the monotonic ReLU / constant shift).
        acc = z[0:NO, :]
        for kk in range(1, KK):
            acc = jnp.maximum(acc, z[kk * NO:(kk + 1) * NO, :])
        out_ref[...] = jnp.maximum(acc + bias_ref[...], 0.0)

    out_flat = pl.pallas_call(
        kernel,
        out_shape=jax.ShapeDtypeStruct((NO, HW), jnp.float32),
        grid=(1,),
        in_specs=[
            pl.BlockSpec((NCp, HW), lambda i: (0, 0)),
            pl.BlockSpec((NEXT, HW, HW), lambda i: (0, 0, 0)),
            pl.BlockSpec((KK * NO, D2), lambda i: (0, 0)),
            pl.BlockSpec((NO, 1), lambda i: (0, 0)),
        ],
        out_specs=pl.BlockSpec((NO, HW), lambda i: (0, 0)),
        scratch_shapes=[pltpu.VMEM((D2, HW), jnp.float32)],
        compiler_params=pltpu.CompilerParams(
            dimension_semantics=("arbitrary",)),
    )(xp, bmats, wbig, bias_col)

    return out_flat.reshape(N, O, H, W)


def upblock_reference(x, wconv, bias, ksize):
    """Pure-JAX reference matching the PyTorch UpBlock forward (f32/HIGHEST)."""
    N, C, H, W = x.shape
    K = ksize
    mh = jnp.asarray(_bilinear_matrix(H, H * K))
    mw = jnp.asarray(_bilinear_matrix(W, W * K))
    up = jnp.einsum('ph,nchw,qw->ncpq', mh, x, mw,
                    precision=jax.lax.Precision.HIGHEST)
    co = jax.lax.conv_general_dilated(
        up, wconv, window_strides=(1, 1), padding=((1, 1), (1, 1)),
        dimension_numbers=('NCHW', 'OIHW', 'NCHW'),
        precision=jax.lax.Precision.HIGHEST)
    co = jnp.maximum(co + bias[None, :, None, None], 0.0)
    return jax.lax.reduce_window(co, -jnp.inf, jax.lax.max,
                                 (1, 1, K, K), (1, 1, K, K), 'VALID')


if __name__ == "__main__":
    N, C_in, C_out, H, W, ksize = 2, 4, 4, 16, 16, 2
    key = jax.random.PRNGKey(0)
    kx, kw, kb = jax.random.split(key, 3)
    x = jax.random.normal(kx, (N, C_in, H, W), jnp.float32)
    wconv = jax.random.normal(kw, (C_out, C_in, 3, 3), jnp.float32) / np.sqrt(C_in * 9)
    bias = 0.1 * jax.random.normal(kb, (C_out,), jnp.float32)

    out = jax.block_until_ready(upblock_forward(x, wconv, bias, ksize))

    ref = upblock_reference(x, wconv, bias, ksize)
    # Tolerance covers single-pass bf16 MXU inputs (x, B) vs the HIGHEST f32
    # reference, as sanctioned by the review.
    np.testing.assert_allclose(np.asarray(out), np.asarray(ref), rtol=2e-2, atol=2e-2)
    print("KERNEL_OK")
</pallas_src>

<mosaic_0001>
module attributes {stable_mosaic.version = 11 : i64} {
  func.func @kernel(%arg0: i32, %arg1: memref<16x256xbf16, #tpu.memory_space<vmem>>, %arg2: memref<16x256x256xbf16, #tpu.memory_space<vmem>>, %arg3: memref<32x256xf32, #tpu.memory_space<vmem>>, %arg4: memref<8x1xf32, #tpu.memory_space<vmem>>, %arg5: memref<8x256xf32, #tpu.memory_space<vmem>>, %arg6: memref<256x256xf32, #tpu.memory_space<vmem>>) attributes {dimension_semantics = [#tpu.dimension_semantics<arbitrary>], iteration_bounds = array<i64: 1>, scalar_prefetch = 0 : i64, scratch_operands = 1 : i64, tpu.core_type = #tpu.core_type<tc>, window_params = [{pipeline_mode = #tpu.pipeline_mode<synchronous>, transform_indices = @transform_0, window_bounds = array<i64: 16, 256>}, {pipeline_mode = #tpu.pipeline_mode<synchronous>, transform_indices = @transform_1, window_bounds = array<i64: 16, 256, 256>}, {pipeline_mode = #tpu.pipeline_mode<synchronous>, transform_indices = @transform_2, window_bounds = array<i64: 32, 256>}, {pipeline_mode = #tpu.pipeline_mode<synchronous>, transform_indices = @transform_3, window_bounds = array<i64: 8, 1>}, {pipeline_mode = #tpu.pipeline_mode<synchronous>, transform_indices = @transform_4, window_bounds = array<i64: 8, 256>}]} {
    %c0 = arith.constant 0 : index
    %c0_0 = arith.constant 0 : index
    %0 = vector.load %arg1[%c0, %c0_0] : memref<16x256xbf16, #tpu.memory_space<vmem>>, vector<16x256xbf16>
    %c0_1 = arith.constant 0 : index
    %c0_2 = arith.constant 0 : index
    %c0_3 = arith.constant 0 : index
    %1 = vector.load %arg2[%c0_1, %c0_2, %c0_3] : memref<16x256x256xbf16, #tpu.memory_space<vmem>>, vector<1x256x256xbf16>
    %2 = vector.shape_cast %1 : vector<1x256x256xbf16> to vector<256x256xbf16>
    %cst = arith.constant dense<0.000000e+00> : vector<16x256xf32>
    %3 = tpu.matmul %0, %2, %cst {dimension_numbers = #tpu.dot_dimension_numbers<[1], [0], [0], [1], [0, 0, 1, 1], [], []>} : vector<16x256xbf16>, vector<256x256xbf16>, vector<16x256xf32> -> vector<16x256xf32>
    %c0_4 = arith.constant 0 : index
    %c0_5 = arith.constant 0 : index
    %4 = vector.load %arg6[%c0_4, %c0_5] : memref<256x256xf32, #tpu.memory_space<vmem>>, vector<16x256xf32>
    tpu.vector_store %arg6[%c0_4, %c0_5], %3 {strides = array<i32>} : memref<256x256xf32, #tpu.memory_space<vmem>>, vector<16x256xf32>,
    %c0_6 = arith.constant 0 : index
    %c0_7 = arith.constant 0 : index
    %5 = vector.load %arg1[%c0_6, %c0_7] : memref<16x256xbf16, #tpu.memory_space<vmem>>, vector<16x256xbf16>
    %c1 = arith.constant 1 : index
    %c0_8 = arith.constant 0 : index
    %c0_9 = arith.constant 0 : index
    %6 = vector.load %arg2[%c1, %c0_8, %c0_9] : memref<16x256x256xbf16, #tpu.memory_space<vmem>>, vector<1x256x256xbf16>
    %7 = vector.shape_cast %6 : vector<1x256x256xbf16> to vector<256x256xbf16>
    %cst_10 = arith.constant dense<0.000000e+00> : vector<16x256xf32>
    %8 = tpu.matmul %5, %7, %cst_10 {dimension_numbers = #tpu.dot_dimension_numbers<[1], [0], [0], [1], [0, 0, 1, 1], [], []>} : vector<16x256xbf16>, vector<256x256xbf16>, vector<16x256xf32> -> vector<16x256xf32>
    %c16 = arith.constant 16 : index
    %c0_11 = arith.constant 0 : index
    %9 = vector.load %arg6[%c16, %c0_11] : memref<256x256xf32, #tpu.memory_space<vmem>>, vector<16x256xf32>
    tpu.vector_store %arg6[%c16, %c0_11], %8 {strides = array<i32>} : memref<256x256xf32, #tpu.memory_space<vmem>>, vector<16x256xf32>,
    %c0_12 = arith.constant 0 : index
    %c0_13 = arith.constant 0 : index
    %10 = vector.load %arg1[%c0_12, %c0_13] : memref<16x256xbf16, #tpu.memory_space<vmem>>, vector<16x256xbf16>
    %c2 = arith.constant 2 : index
    %c0_14 = arith.constant 0 : index
    %c0_15 = arith.constant 0 : index
    %11 = vector.load %arg2[%c2, %c0_14, %c0_15] : memref<16x256x256xbf16, #tpu.memory_space<vmem>>, vector<1x256x256xbf16>
    %12 = vector.shape_cast %11 : vector<1x256x256xbf16> to vector<256x256xbf16>
    %cst_16 = arith.constant dense<0.000000e+00> : vector<16x256xf32>
    %13 = tpu.matmul %10, %12, %cst_16 {dimension_numbers = #tpu.dot_dimension_numbers<[1], [0], [0], [1], [0, 0, 1, 1], [], []>} : vector<16x256xbf16>, vector<256x256xbf16>, vector<16x256xf32> -> vector<16x256xf32>
    %c32 = arith.constant 32 : index
    %c0_17 = arith.constant 0 : index
    %14 = vector.load %arg6[%c32, %c0_17] : memref<256x256xf32, #tpu.memory_space<vmem>>, vector<16x256xf32>
    tpu.vector_store %arg6[%c32, %c0_17], %13 {strides = array<i32>} : memref<256x256xf32, #tpu.memory_space<vmem>>, vector<16x256xf32>,
    %c0_18 = arith.constant 0 : index
    %c0_19 = arith.constant 0 : index
    %15 = vector.load %arg1[%c0_18, %c0_19] : memref<16x256xbf16, #tpu.memory_space<vmem>>, vector<16x256xbf16>
    %c3 = arith.constant 3 : index
    %c0_20 = arith.constant 0 : index
    %c0_21 = arith.constant 0 : index
    %16 = vector.load %arg2[%c3, %c0_20, %c0_21] : memref<16x256x256xbf16, #tpu.memory_space<vmem>>, vector<1x256x256xbf16>
    %17 = vector.shape_cast %16 : vector<1x256x256xbf16> to vector<256x256xbf16>
    %cst_22 = arith.constant dense<0.000000e+00> : vector<16x256xf32>
    %18 = tpu.matmul %15, %17, %cst_22 {dimension_numbers = #tpu.dot_dimension_numbers<[1], [0], [0], [1], [0, 0, 1, 1], [], []>} : vector<16x256xbf16>, vector<256x256xbf16>, vector<16x256xf32> -> vector<16x256xf32>
    %c48 = arith.constant 48 : index
    %c0_23 = arith.constant 0 : index
    %19 = vector.load %arg6[%c48, %c0_23] : memref<256x256xf32, #tpu.memory_space<vmem>>, vector<16x256xf32>
    tpu.vector_store %arg6[%c48, %c0_23], %18 {strides = array<i32>} : memref<256x256xf32, #tpu.memory_space<vmem>>, vector<16x256xf32>,
    %c0_24 = arith.constant 0 : index
    %c0_25 = arith.constant 0 : index
    %20 = vector.load %arg1[%c0_24, %c0_25] : memref<16x256xbf16, #tpu.memory_space<vmem>>, vector<16x256xbf16>
    %c4 = arith.constant 4 : index
    %c0_26 = arith.constant 0 : index
    %c0_27 = arith.constant 0 : index
    %21 = vector.load %arg2[%c4, %c0_26, %c0_27] : memref<16x256x256xbf16, #tpu.memory_space<vmem>>, vector<1x256x256xbf16>
    %22 = vector.shape_cast %21 : vector<1x256x256xbf16> to vector<256x256xbf16>
    %cst_28 = arith.constant dense<0.000000e+00> : vector<16x256xf32>
    %23 = tpu.matmul %20, %22, %cst_28 {dimension_numbers = #tpu.dot_dimension_numbers<[1], [0], [0], [1], [0, 0, 1, 1], [], []>} : vector<16x256xbf16>, vector<256x256xbf16>, vector<16x256xf32> -> vector<16x256xf32>
    %c64 = arith.constant 64 : index
    %c0_29 = arith.constant 0 : index
    %24 = vector.load %arg6[%c64, %c0_29] : memref<256x256xf32, #tpu.memory_space<vmem>>, vector<16x256xf32>
    tpu.vector_store %arg6[%c64, %c0_29], %23 {strides = array<i32>} : memref<256x256xf32, #tpu.memory_space<vmem>>, vector<16x256xf32>,
    %c0_30 = arith.constant 0 : index
    %c0_31 = arith.constant 0 : index
    %25 = vector.load %arg1[%c0_30, %c0_31] : memref<16x256xbf16, #tpu.memory_space<vmem>>, vector<16x256xbf16>
    %c5 = arith.constant 5 : index
    %c0_32 = arith.constant 0 : index
    %c0_33 = arith.constant 0 : index
    %26 = vector.load %arg2[%c5, %c0_32, %c0_33] : memref<16x256x256xbf16, #tpu.memory_space<vmem>>, vector<1x256x256xbf16>
    %27 = vector.shape_cast %26 : vector<1x256x256xbf16> to vector<256x256xbf16>
    %cst_34 = arith.constant dense<0.000000e+00> : vector<16x256xf32>
    %28 = tpu.matmul %25, %27, %cst_34 {dimension_numbers = #tpu.dot_dimension_numbers<[1], [0], [0], [1], [0, 0, 1, 1], [], []>} : vector<16x256xbf16>, vector<256x256xbf16>, vector<16x256xf32> -> vector<16x256xf32>
    %c80 = arith.constant 80 : index
    %c0_35 = arith.constant 0 : index
    %29 = vector.load %arg6[%c80, %c0_35] : memref<256x256xf32, #tpu.memory_space<vmem>>, vector<16x256xf32>
    tpu.vector_store %arg6[%c80, %c0_35], %28 {strides = array<i32>} : memref<256x256xf32, #tpu.memory_space<vmem>>, vector<16x256xf32>,
    %c0_36 = arith.constant 0 : index
    %c0_37 = arith.constant 0 : index
    %30 = vector.load %arg1[%c0_36, %c0_37] : memref<16x256xbf16, #tpu.memory_space<vmem>>, vector<16x256xbf16>
    %c6 = arith.constant 6 : index
    %c0_38 = arith.constant 0 : index
    %c0_39 = arith.constant 0 : index
    %31 = vector.load %arg2[%c6, %c0_38, %c0_39] : memref<16x256x256xbf16, #tpu.memory_space<vmem>>, vector<1x256x256xbf16>
    %32 = vector.shape_cast %31 : vector<1x256x256xbf16> to vector<256x256xbf16>
    %cst_40 = arith.constant dense<0.000000e+00> : vector<16x256xf32>
    %33 = tpu.matmul %30, %32, %cst_40 {dimension_numbers = #tpu.dot_dimension_numbers<[1], [0], [0], [1], [0, 0, 1, 1], [], []>} : vector<16x256xbf16>, vector<256x256xbf16>, vector<16x256xf32> -> vector<16x256xf32>
    %c96 = arith.constant 96 : index
    %c0_41 = arith.constant 0 : index
    %34 = vector.load %arg6[%c96, %c0_41] : memref<256x256xf32, #tpu.memory_space<vmem>>, vector<16x256xf32>
    tpu.vector_store %arg6[%c96, %c0_41], %33 {strides = array<i32>} : memref<256x256xf32, #tpu.memory_space<vmem>>, vector<16x256xf32>,
    %c0_42 = arith.constant 0 : index
    %c0_43 = arith.constant 0 : index
    %35 = vector.load %arg1[%c0_42, %c0_43] : memref<16x256xbf16, #tpu.memory_space<vmem>>, vector<16x256xbf16>
    %c7 = arith.constant 7 : index
    %c0_44 = arith.constant 0 : index
    %c0_45 = arith.constant 0 : index
    %36 = vector.load %arg2[%c7, %c0_44, %c0_45] : memref<16x256x256xbf16, #tpu.memory_space<vmem>>, vector<1x256x256xbf16>
    %37 = vector.shape_cast %36 : vector<1x256x256xbf16> to vector<256x256xbf16>
    %cst_46 = arith.constant dense<0.000000e+00> : vector<16x256xf32>
    %38 = tpu.matmul %35, %37, %cst_46 {dimension_numbers = #tpu.dot_dimension_numbers<[1], [0], [0], [1], [0, 0, 1, 1], [], []>} : vector<16x256xbf16>, vector<256x256xbf16>, vector<16x256xf32> -> vector<16x256xf32>
    %c112 = arith.constant 112 : index
    %c0_47 = arith.constant 0 : index
    %39 = vector.load %arg6[%c112, %c0_47] : memref<256x256xf32, #tpu.memory_space<vmem>>, vector<16x256xf32>
    tpu.vector_store %arg6[%c112, %c0_47], %38 {strides = array<i32>} : memref<256x256xf32, #tpu.memory_space<vmem>>, vector<16x256xf32>,
    %c0_48 = arith.constant 0 : index
    %c0_49 = arith.constant 0 : index
    %40 = vector.load %arg1[%c0_48, %c0_49] : memref<16x256xbf16, #tpu.memory_space<vmem>>, vector<16x256xbf16>
    %c8 = arith.constant 8 : index
    %c0_50 = arith.constant 0 : index
    %c0_51 = arith.constant 0 : index
    %41 = vector.load %arg2[%c8, %c0_50, %c0_51] : memref<16x256x256xbf16, #tpu.memory_space<vmem>>, vector<1x256x256xbf16>
    %42 = vector.shape_cast %41 : vector<1x256x256xbf16> to vector<256x256xbf16>
    %cst_52 = arith.constant dense<0.000000e+00> : vector<16x256xf32>
    %43 = tpu.matmul %40, %42, %cst_52 {dimension_numbers = #tpu.dot_dimension_numbers<[1], [0], [0], [1], [0, 0, 1, 1], [], []>} : vector<16x256xbf16>, vector<256x256xbf16>, vector<16x256xf32> -> vector<16x256xf32>
    %c128 = arith.constant 128 : index
    %c0_53 = arith.constant 0 : index
    %44 = vector.load %arg6[%c128, %c0_53] : memref<256x256xf32, #tpu.memory_space<vmem>>, vector<16x256xf32>
    tpu.vector_store %arg6[%c128, %c0_53], %43 {strides = array<i32>} : memref<256x256xf32, #tpu.memory_space<vmem>>, vector<16x256xf32>,
    %c0_54 = arith.constant 0 : index
    %c0_55 = arith.constant 0 : index
    %45 = vector.load %arg1[%c0_54, %c0_55] : memref<16x256xbf16, #tpu.memory_space<vmem>>, vector<16x256xbf16>
    %c9 = arith.constant 9 : index
    %c0_56 = arith.constant 0 : index
    %c0_57 = arith.constant 0 : index
    %46 = vector.load %arg2[%c9, %c0_56, %c0_57] : memref<16x256x256xbf16, #tpu.memory_space<vmem>>, vector<1x256x256xbf16>
    %47 = vector.shape_cast %46 : vector<1x256x256xbf16> to vector<256x256xbf16>
    %cst_58 = arith.constant dense<0.000000e+00> : vector<16x256xf32>
    %48 = tpu.matmul %45, %47, %cst_58 {dimension_numbers = #tpu.dot_dimension_numbers<[1], [0], [0], [1], [0, 0, 1, 1], [], []>} : vector<16x256xbf16>, vector<256x256xbf16>, vector<16x256xf32> -> vector<16x256xf32>
    %c144 = arith.constant 144 : index
    %c0_59 = arith.constant 0 : index
    %49 = vector.load %arg6[%c144, %c0_59] : memref<256x256xf32, #tpu.memory_space<vmem>>, vector<16x256xf32>
    tpu.vector_store %arg6[%c144, %c0_59], %48 {strides = array<i32>} : memref<256x256xf32, #tpu.memory_space<vmem>>, vector<16x256xf32>,
    %c0_60 = arith.constant 0 : index
    %c0_61 = arith.constant 0 : index
    %50 = vector.load %arg1[%c0_60, %c0_61] : memref<16x256xbf16, #tpu.memory_space<vmem>>, vector<16x256xbf16>
    %c10 = arith.constant 10 : index
    %c0_62 = arith.constant 0 : index
    %c0_63 = arith.constant 0 : index
    %51 = vector.load %arg2[%c10, %c0_62, %c0_63] : memref<16x256x256xbf16, #tpu.memory_space<vmem>>, vector<1x256x256xbf16>
    %52 = vector.shape_cast %51 : vector<1x256x256xbf16> to vector<256x256xbf16>
    %cst_64 = arith.constant dense<0.000000e+00> : vector<16x256xf32>
    %53 = tpu.matmul %50, %52, %cst_64 {dimension_numbers = #tpu.dot_dimension_numbers<[1], [0], [0], [1], [0, 0, 1, 1], [], []>} : vector<16x256xbf16>, vector<256x256xbf16>, vector<16x256xf32> -> vector<16x256xf32>
    %c160 = arith.constant 160 : index
    %c0_65 = arith.constant 0 : index
    %54 = vector.load %arg6[%c160, %c0_65] : memref<256x256xf32, #tpu.memory_space<vmem>>, vector<16x256xf32>
    tpu.vector_store %arg6[%c160, %c0_65], %53 {strides = array<i32>} : memref<256x256xf32, #tpu.memory_space<vmem>>, vector<16x256xf32>,
    %c0_66 = arith.constant 0 : index
    %c0_67 = arith.constant 0 : index
    %55 = vector.load %arg1[%c0_66, %c0_67] : memref<16x256xbf16, #tpu.memory_space<vmem>>, vector<16x256xbf16>
    %c11 = arith.constant 11 : index
    %c0_68 = arith.constant 0 : index
    %c0_69 = arith.constant 0 : index
    %56 = vector.load %arg2[%c11, %c0_68, %c0_69] : memref<16x256x256xbf16, #tpu.memory_space<vmem>>, vector<1x256x256xbf16>
    %57 = vector.shape_cast %56 : vector<1x256x256xbf16> to vector<256x256xbf16>
    %cst_70 = arith.constant dense<0.000000e+00> : vector<16x256xf32>
    %58 = tpu.matmul %55, %57, %cst_70 {dimension_numbers = #tpu.dot_dimension_numbers<[1], [0], [0], [1], [0, 0, 1, 1], [], []>} : vector<16x256xbf16>, vector<256x256xbf16>, vector<16x256xf32> -> vector<16x256xf32>
    %c176 = arith.constant 176 : index
    %c0_71 = arith.constant 0 : index
    %59 = vector.load %arg6[%c176, %c0_71] : memref<256x256xf32, #tpu.memory_space<vmem>>, vector<16x256xf32>
    tpu.vector_store %arg6[%c176, %c0_71], %58 {strides = array<i32>} : memref<256x256xf32, #tpu.memory_space<vmem>>, vector<16x256xf32>,
    %c0_72 = arith.constant 0 : index
    %c0_73 = arith.constant 0 : index
    %60 = vector.load %arg1[%c0_72, %c0_73] : memref<16x256xbf16, #tpu.memory_space<vmem>>, vector<16x256xbf16>
    %c12 = arith.constant 12 : index
    %c0_74 = arith.constant 0 : index
    %c0_75 = arith.constant 0 : index
    %61 = vector.load %arg2[%c12, %c0_74, %c0_75] : memref<16x256x256xbf16, #tpu.memory_space<vmem>>, vector<1x256x256xbf16>
    %62 = vector.shape_cast %61 : vector<1x256x256xbf16> to vector<256x256xbf16>
    %cst_76 = arith.constant dense<0.000000e+00> : vector<16x256xf32>
    %63 = tpu.matmul %60, %62, %cst_76 {dimension_numbers = #tpu.dot_dimension_numbers<[1], [0], [0], [1], [0, 0, 1, 1], [], []>} : vector<16x256xbf16>, vector<256x256xbf16>, vector<16x256xf32> -> vector<16x256xf32>
    %c192 = arith.constant 192 : index
    %c0_77 = arith.constant 0 : index
    %64 = vector.load %arg6[%c192, %c0_77] : memref<256x256xf32, #tpu.memory_space<vmem>>, vector<16x256xf32>
    tpu.vector_store %arg6[%c192, %c0_77], %63 {strides = array<i32>} : memref<256x256xf32, #tpu.memory_space<vmem>>, vector<16x256xf32>,
    %c0_78 = arith.constant 0 : index
    %c0_79 = arith.constant 0 : index
    %65 = vector.load %arg1[%c0_78, %c0_79] : memref<16x256xbf16, #tpu.memory_space<vmem>>, vector<16x256xbf16>
    %c13 = arith.constant 13 : index
    %c0_80 = arith.constant 0 : index
    %c0_81 = arith.constant 0 : index
    %66 = vector.load %arg2[%c13, %c0_80, %c0_81] : memref<16x256x256xbf16, #tpu.memory_space<vmem>>, vector<1x256x256xbf16>
    %67 = vector.shape_cast %66 : vector<1x256x256xbf16> to vector<256x256xbf16>
    %cst_82 = arith.constant dense<0.000000e+00> : vector<16x256xf32>
    %68 = tpu.matmul %65, %67, %cst_82 {dimension_numbers = #tpu.dot_dimension_numbers<[1], [0], [0], [1], [0, 0, 1, 1], [], []>} : vector<16x256xbf16>, vector<256x256xbf16>, vector<16x256xf32> -> vector<16x256xf32>
    %c208 = arith.constant 208 : index
    %c0_83 = arith.constant 0 : index
    %69 = vector.load %arg6[%c208, %c0_83] : memref<256x256xf32, #tpu.memory_space<vmem>>, vector<16x256xf32>
    tpu.vector_store %arg6[%c208, %c0_83], %68 {strides = array<i32>} : memref<256x256xf32, #tpu.memory_space<vmem>>, vector<16x256xf32>,
    %c0_84 = arith.constant 0 : index
    %c0_85 = arith.constant 0 : index
    %70 = vector.load %arg1[%c0_84, %c0_85] : memref<16x256xbf16, #tpu.memory_space<vmem>>, vector<16x256xbf16>
    %c14 = arith.constant 14 : index
    %c0_86 = arith.constant 0 : index
    %c0_87 = arith.constant 0 : index
    %71 = vector.load %arg2[%c14, %c0_86, %c0_87] : memref<16x256x256xbf16, #tpu.memory_space<vmem>>, vector<1x256x256xbf16>
    %72 = vector.shape_cast %71 : vector<1x256x256xbf16> to vector<256x256xbf16>
    %cst_88 = arith.constant dense<0.000000e+00> : vector<16x256xf32>
    %73 = tpu.matmul %70, %72, %cst_88 {dimension_numbers = #tpu.dot_dimension_numbers<[1], [0], [0], [1], [0, 0, 1, 1], [], []>} : vector<16x256xbf16>, vector<256x256xbf16>, vector<16x256xf32> -> vector<16x256xf32>
    %c224 = arith.constant 224 : index
    %c0_89 = arith.constant 0 : index
    %74 = vector.load %arg6[%c224, %c0_89] : memref<256x256xf32, #tpu.memory_space<vmem>>, vector<16x256xf32>
    tpu.vector_store %arg6[%c224, %c0_89], %73 {strides = array<i32>} : memref<256x256xf32, #tpu.memory_space<vmem>>, vector<16x256xf32>,
    %c0_90 = arith.constant 0 : index
    %c0_91 = arith.constant 0 : index
    %75 = vector.load %arg1[%c0_90, %c0_91] : memref<16x256xbf16, #tpu.memory_space<vmem>>, vector<16x256xbf16>
    %c15 = arith.constant 15 : index
    %c0_92 = arith.constant 0 : index
    %c0_93 = arith.constant 0 : index
    %76 = vector.load %arg2[%c15, %c0_92, %c0_93] : memref<16x256x256xbf16, #tpu.memory_space<vmem>>, vector<1x256x256xbf16>
    %77 = vector.shape_cast %76 : vector<1x256x256xbf16> to vector<256x256xbf16>
    %cst_94 = arith.constant dense<0.000000e+00> : vector<16x256xf32>
    %78 = tpu.matmul %75, %77, %cst_94 {dimension_numbers = #tpu.dot_dimension_numbers<[1], [0], [0], [1], [0, 0, 1, 1], [], []>} : vector<16x256xbf16>, vector<256x256xbf16>, vector<16x256xf32> -> vector<16x256xf32>
    %c240 = arith.constant 240 : index
    %c0_95 = arith.constant 0 : index
    %79 = vector.load %arg6[%c240, %c0_95] : memref<256x256xf32, #tpu.memory_space<vmem>>, vector<16x256xf32>
    tpu.vector_store %arg6[%c240, %c0_95], %78 {strides = array<i32>} : memref<256x256xf32, #tpu.memory_space<vmem>>, vector<16x256xf32>,
    %c0_96 = arith.constant 0 : index
    %c0_97 = arith.constant 0 : index
    %80 = vector.load %arg3[%c0_96, %c0_97] : memref<32x256xf32, #tpu.memory_space<vmem>>, vector<32x256xf32>
    %c0_98 = arith.constant 0 : index
    %c0_99 = arith.constant 0 : index
    %81 = vector.load %arg6[%c0_98, %c0_99] : memref<256x256xf32, #tpu.memory_space<vmem>>, vector<256x256xf32>
    %cst_100 = arith.constant dense<0.000000e+00> : vector<32x256xf32>
    %82 = tpu.matmul %80, %81, %cst_100 {dimension_numbers = #tpu.dot_dimension_numbers<[1], [0], [0], [1], [0, 0, 1, 1], [], []>} : vector<32x256xf32>, vector<256x256xf32>, vector<32x256xf32> -> vector<32x256xf32>
    %83 = vector.extract_strided_slice %82 {offsets = [0, 0], sizes = [8, 256], strides = [1, 1]} : vector<32x256xf32> to vector<8x256xf32>
    %84 = vector.extract_strided_slice %82 {offsets = [8, 0], sizes = [8, 256], strides = [1, 1]} : vector<32x256xf32> to vector<8x256xf32>
    %85 = arith.maximumf %83, %84 : vector<8x256xf32>
    %86 = vector.extract_strided_slice %82 {offsets = [16, 0], sizes = [8, 256], strides = [1, 1]} : vector<32x256xf32> to vector<8x256xf32>
    %87 = arith.maximumf %85, %86 : vector<8x256xf32>
    %88 = vector.extract_strided_slice %82 {offsets = [24, 0], sizes = [8, 256], strides = [1, 1]} : vector<32x256xf32> to vector<8x256xf32>
    %89 = arith.maximumf %87, %88 : vector<8x256xf32>
    %c0_101 = arith.constant 0 : index
    %c0_102 = arith.constant 0 : index
    %90 = vector.load %arg4[%c0_101, %c0_102] : memref<8x1xf32, #tpu.memory_space<vmem>>, vector<8x1xf32>
    %91 = vector.broadcast %90 : vector<8x1xf32> to vector<8x256xf32>
    %92 = arith.addf %89, %91 : vector<8x256xf32>
    %cst_103 = arith.constant 0.000000e+00 : f32
    %93 = vector.broadcast %cst_103 : f32 to vector<8x256xf32>
    %94 = arith.maximumf %92, %93 : vector<8x256xf32>
    %c0_104 = arith.constant 0 : index
    %c0_105 = arith.constant 0 : index
    %95 = vector.load %arg5[%c0_104, %c0_105] : memref<8x256xf32, #tpu.memory_space<vmem>>, vector<8x256xf32>
    tpu.vector_store %arg5[%c0_104, %c0_105], %94 {strides = array<i32>} : memref<8x256xf32, #tpu.memory_space<vmem>>, vector<8x256xf32>,
    return
  }
  func.func @transform_0(%arg0: i32) -> (i32, i32) {
    %c0_i32 = arith.constant 0 : i32
    %c0_i32_0 = arith.constant 0 : i32
    %c0_i32_1 = arith.constant 0 : i32
    return %c0_i32, %c0_i32_0 : i32, i32
  }
  func.func @transform_1(%arg0: i32) -> (i32, i32, i32) {
    %c0_i32 = arith.constant 0 : i32
    %c0_i32_0 = arith.constant 0 : i32
    %c0_i32_1 = arith.constant 0 : i32
    %c0_i32_2 = arith.constant 0 : i32
    return %c0_i32, %c0_i32_0, %c0_i32_1 : i32, i32, i32
  }
  func.func @transform_2(%arg0: i32) -> (i32, i32) {
    %c0_i32 = arith.constant 0 : i32
    %c0_i32_0 = arith.constant 0 : i32
    %c0_i32_1 = arith.constant 0 : i32
    return %c0_i32, %c0_i32_0 : i32, i32
  }
  func.func @transform_3(%arg0: i32) -> (i32, i32) {
    %c0_i32 = arith.constant 0 : i32
    %c0_i32_0 = arith.constant 0 : i32
    %c0_i32_1 = arith.constant 0 : i32
    return %c0_i32, %c0_i32_0 : i32, i32
  }
  func.func @transform_4(%arg0: i32) -> (i32, i32) {
    %c0_i32 = arith.constant 0 : i32
    %c0_i32_0 = arith.constant 0 : i32
    %c0_i32_1 = arith.constant 0 : i32
    return %c0_i32, %c0_i32_0 : i32, i32
  }
}

</mosaic_0001>

<bundles_post_ra>
// kernel: tpu_custom_call.1
= control target key start
LH: loop header
LB: loop body
LE: loop exit
PB: predicated region body
PF: predicated region fallthrough
CT: control target
= control target key end

     0   :  { %9 = vsyncpa [#allocation4], 0  ;;  %s6044_s0 = inlined_call_operand.hbm [shape: bf16[16,256], index: 0, kind: input, shape index: {}]   ;;  %s6045_s1 = inlined_call_operand.hbm [shape: bf16[16,256,256], index: 1, kind: input, shape index: {}]   ;;  %s6046_s2 = inlined_call_operand.hbm [shape: f32[32,256], index: 2, kind: input, shape index: {}]   ;;  %s6047_s3 = inlined_call_operand.vmem [shape: f32[8,1], index: 3, kind: input, shape index: {}]   ;;  %s6048_s4 = inlined_call_operand.hbm [shape: f32[8,256], index: 4, kind: output, shape index: {}]  }
   0x1   :  { %10 = vsyncpa [#allocation7], 0 }
   0x2   :  { %11 = vsyncpa [#allocation5], 0  ;;  %s5775_s15 = smov [#allocation6]   ;;  %s5776_s17 = smov [#allocation3]  }
   0x3   :  { %s29_s16 = sshll.u32 %s5775_s15, 4  ;;  %s17_s18 = sshll.u32 %s5776_s17, 4  ;;  %s30_s16 = int_to_ptr.vmem [resolvable:$true] %s29_s16  ;;  %s5809_s18 = int_to_ptr.vmem [resolvable:$true] %s17_s18 }
   0x4   :  { %s5681_s21 = scalar_lea.hbm %s6045_s1, 65536 }
   0x5   :  { %p5682_p0 = scmp.ne.s32.totalorder %s6045_s1, %s5681_s21  ;;  %p5685_p1 = scmp.lt.u32.totalorder %s5681_s21, %s6045_s1 }
   0x7   :  { %p5687_p2 = pnand %p5685_p1, %p5682_p0 }
   0x9   :  { %5690 = shalt.err (!%p5687_p2)
}
   0xa   :  { %s5691_s26 = scalar_lea.vmem %s30_s16, 65536  ;;  %p5696_p4 = scmp.lt.s32.totalorder %s30_s16, %s30_s16 }
   0xb   :  { %p5692_p3 = scmp.ne.s32.totalorder %s30_s16, %s5691_s26  ;;  %p5697_p5 = scmp.lt.s32.totalorder %s5691_s26, %s5691_s26 }
   0xd   :  { %p5698_p6 = por %p5697_p5, %p5696_p4 }
   0xf   :  { %p5699_p7 = pnand %p5698_p6, %p5692_p3 }
  0x11   :  { %5702 = shalt.err (!%p5699_p7)
}
  0x12   :  { %s5777_s27 = smov 128   ;;  %s5778_s28 = smov 8  }
  0x13   :  { %35 = dma.hbm_to_vmem [thread:$0]  %s6045_s1, 65536, %s30_s16, [#allocation7], %s5777_s27, %s5777_s27, %s5778_s28  }
  0x14   :  { %s5703_s7 = scalar_lea.hbm %s6044_s0, 256 }
  0x15   :  { %p5704_p8 = scmp.ne.s32.totalorder %s6044_s0, %s5703_s7  ;;  %p5707_p9 = scmp.lt.u32.totalorder %s5703_s7, %s6044_s0 }
  0x17   :  { %p5709_p10 = pnand %p5707_p9, %p5704_p8 }
  0x19   :  { %5712 = shalt.err (!%p5709_p10)
}
  0x1a   :  { %s5713_s12 = scalar_lea.vmem %s5809_s18, 256  ;;  %p5718_p12 = scmp.lt.s32.totalorder %s5809_s18, %s5809_s18 }
  0x1b   :  { %p5714_p11 = scmp.ne.s32.totalorder %s5809_s18, %s5713_s12  ;;  %p5719_p13 = scmp.lt.s32.totalorder %s5713_s12, %s5713_s12 }
  0x1d   :  { %p5720_p0 = por %p5719_p13, %p5718_p12 }
  0x1f   :  { %p5721_p1 = pnand %p5720_p0, %p5714_p11 }
  0x21   :  { %5724 = shalt.err (!%p5721_p1)
}
  0x22   :  { %23 = dma.hbm_to_vmem [thread:$0]  %s6044_s0, 256, %s5809_s18, [#allocation4], %s5777_s27, %s5777_s27, %s5778_s28  }
  0x23   :  { %s5779_s14 = smov [#allocation8]   ;;  %s5725_s19 = scalar_lea.hbm %s6046_s2, 1024 }
  0x24   :  { %s41_s15 = sshll.u32 %s5779_s14, 4  ;;  %p5726_p2 = scmp.ne.s32.totalorder %s6046_s2, %s5725_s19  ;;  %s42_s15 = int_to_ptr.vmem [resolvable:$true] %s41_s15 }
  0x25   :  { %p5729_p3 = scmp.lt.u32.totalorder %s5725_s19, %s6046_s2 }
  0x27   :  { %p5731_p4 = pnand %p5729_p3, %p5726_p2 }
  0x29   :  { %5734 = shalt.err (!%p5731_p4)
}
  0x2a   :  { %s5735_s24 = scalar_lea.vmem %s42_s15, 1024  ;;  %p5740_p6 = scmp.lt.s32.totalorder %s42_s15, %s42_s15 }
  0x2b   :  { %p5736_p5 = scmp.ne.s32.totalorder %s42_s15, %s5735_s24  ;;  %p5741_p7 = scmp.lt.s32.totalorder %s5735_s24, %s5735_s24 }
  0x2d   :  { %p5742_p8 = por %p5741_p7, %p5740_p6 }
  0x2f   :  { %p5743_p9 = pnand %p5742_p8, %p5736_p5 }
  0x31   :  { %5746 = shalt.err (!%p5743_p9)
}
  0x32   :  { %s5780_s0 = smov 256   ;;  %s5781_s18 = smov 16  }
  0x33   :  { %47 = dma.hbm_to_vmem [thread:$0]  %s6046_s2, 1024, %s42_s15, [#allocation7], %s5780_s0, %s5780_s0, %s5781_s18  }
  0x34   :  { %5769 = dma.done.wait [#allocation4], 256  }
  0x35   :  { %5770 = vsyncadd [#allocation4], 4294967040 }
  0x36   :  { %5771 = dma.done.wait [#allocation7], 66560  }
  0x37   :  { %5772 = vsyncadd [#allocation7], 4294900736  ;;  %v4903_v0 = vld [vmem:[#allocation6 + $0x4] ss:$8 sps:$4 sm:$0xff]   ;;  %v4907_v2 = vld [vmem:[#allocation6] ss:$8 sps:$4 sm:$0xff]  }
  0x38   :  { %v4905_v1 = vld [vmem:[#allocation6 + $0x204] ss:$8 sps:$4 sm:$0xff]   ;;  %263 = vmatprep.subr.bf16.mxu1 %v4903_v0  ;;  %v4908_v3 = vld [vmem:[#allocation6 + $0x200] ss:$8 sps:$4 sm:$0xff]   ;;  %v4909_v4 = vld [vmem:[#allocation6 + $0x14] ss:$8 sps:$4 sm:$0xff]  }
  0x39   :  { %767 = vmatprep.subr.bf16.mxu0 %v4905_v1  ;;  %264 = vmatpush1.bf16.msra.mxu1 %v4907_v2  ;;  %v4911_v5 = vld [vmem:[#allocation6 + $0x214] ss:$8 sps:$4 sm:$0xff]   ;;  %v4913_v6 = vld [vmem:[#allocation6 + $0x10] ss:$8 sps:$4 sm:$0xff]   ;;  %v4915_v8 = vld [vmem:[#allocation6 + $0x24] ss:$8 sps:$4 sm:$0xff]  }
  0x3a   :  { %768 = vmatpush1.bf16.msra.mxu0 %v4908_v3  ;;  %265 = vmatprep.subr.bf16.mxu1 %v4909_v4  ;;  %v4914_v7 = vld [vmem:[#allocation6 + $0x210] ss:$8 sps:$4 sm:$0xff]   ;;  %v4917_v9 = vld [vmem:[#allocation6 + $0x224] ss:$8 sps:$4 sm:$0xff]   ;;  %v4919_v10 = vld [vmem:[#allocation6 + $0x20] ss:$8 sps:$4 sm:$0xff]  }
  0x3b   :  { %769 = vmatprep.subr.bf16.mxu0 %v4911_v5  ;;  %v4920_v11 = vld [vmem:[#allocation6 + $0x220] ss:$8 sps:$4 sm:$0xff]   ;;  %v4921_v12 = vld [vmem:[#allocation6 + $0x34] ss:$8 sps:$4 sm:$0xff]   ;;  %v4925_v14 = vld [vmem:[#allocation6 + $0x30] ss:$8 sps:$4 sm:$0xff]  }
  0x3c   :  { %v4923_v13 = vld [vmem:[#allocation6 + $0x234] ss:$8 sps:$4 sm:$0xff]   ;;  %v4926_v15 = vld [vmem:[#allocation6 + $0x230] ss:$8 sps:$4 sm:$0xff]   ;;  %v4927_v16 = vld [vmem:[#allocation6 + $0x44] ss:$8 sps:$4 sm:$0xff]  }
  0x3d   :  { %266 = vmatpush1.bf16.msra.mxu1 %v4913_v6  ;;  %v4929_v17 = vld [vmem:[#allocation6 + $0x244] ss:$8 sps:$4 sm:$0xff]   ;;  %v4931_v18 = vld [vmem:[#allocation6 + $0x40] ss:$8 sps:$4 sm:$0xff]   ;;  %v4933_v20 = vld [vmem:[#allocation6 + $0x54] ss:$8 sps:$4 sm:$0xff]  }
  0x3e   :  { %770 = vmatpush1.bf16.msra.mxu0 %v4914_v7  ;;  %267 = vmatprep.subr.bf16.mxu1 %v4915_v8  ;;  %v4932_v19 = vld [vmem:[#allocation6 + $0x240] ss:$8 sps:$4 sm:$0xff]   ;;  %v4935_v21 = vld [vmem:[#allocation6 + $0x254] ss:$8 sps:$4 sm:$0xff]   ;;  %v4937_v22 = vld [vmem:[#allocation6 + $0x50] ss:$8 sps:$4 sm:$0xff]  }
  0x3f   :  { %771 = vmatprep.subr.bf16.mxu0 %v4917_v9  ;;  %v4938_v23 = vld [vmem:[#allocation6 + $0x250] ss:$8 sps:$4 sm:$0xff]   ;;  %v4939_v24 = vld [vmem:[#allocation6 + $0x64] ss:$8 sps:$4 sm:$0xff]   ;;  %v4943_v26 = vld [vmem:[#allocation6 + $0x60] ss:$8 sps:$4 sm:$0xff]  }
  0x40   :  { %v4941_v25 = vld [vmem:[#allocation6 + $0x264] ss:$8 sps:$4 sm:$0xff]   ;;  %v4944_v27 = vld [vmem:[#allocation6 + $0x260] ss:$8 sps:$4 sm:$0xff]   ;;  %v4945_v28 = vld [vmem:[#allocation6 + $0x74] ss:$8 sps:$4 sm:$0xff]  }
  0x41   :  { %268 = vmatpush1.bf16.msra.mxu1 %v4919_v10  ;;  %v4947_v29 = vld [vmem:[#allocation6 + $0x274] ss:$8 sps:$4 sm:$0xff]   ;;  %v4949_v30 = vld [vmem:[#allocation6 + $0x70] ss:$8 sps:$4 sm:$0xff]   ;;  %v4951_v32 = vld [vmem:[#allocation6 + $0x84] ss:$8 sps:$4 sm:$0xff]  }
  0x42   :  { %772 = vmatpush1.bf16.msra.mxu0 %v4920_v11  ;;  %269 = vmatprep.subr.bf16.mxu1 %v4921_v12  ;;  %v4950_v31 = vld [vmem:[#allocation6 + $0x270] ss:$8 sps:$4 sm:$0xff]   ;;  %v4953_v33 = vld [vmem:[#allocation6 + $0x284] ss:$8 sps:$4 sm:$0xff]   ;;  %v4955_v34 = vld [vmem:[#allocation6 + $0x80] ss:$8 sps:$4 sm:$0xff]  }
  0x43   :  { %773 = vmatprep.subr.bf16.mxu0 %v4923_v13  ;;  %v4956_v35 = vld [vmem:[#allocation6 + $0x280] ss:$8 sps:$4 sm:$0xff]   ;;  %v4957_v36 = vld [vmem:[#allocation6 + $0x94] ss:$8 sps:$4 sm:$0xff]   ;;  %v4961_v38 = vld [vmem:[#allocation6 + $0x90] ss:$8 sps:$4 sm:$0xff]  }
  0x44   :  { %v4959_v37 = vld [vmem:[#allocation6 + $0x294] ss:$8 sps:$4 sm:$0xff]   ;;  %v4962_v39 = vld [vmem:[#allocation6 + $0x290] ss:$8 sps:$4 sm:$0xff]   ;;  %v4963_v40 = vld [vmem:[#allocation6 + $0xa4] ss:$8 sps:$4 sm:$0xff]  }
  0x45   :  { %270 = vmatpush1.bf16.msra.mxu1 %v4925_v14  ;;  %v4965_v41 = vld [vmem:[#allocation6 + $0x2a4] ss:$8 sps:$4 sm:$0xff]   ;;  %v4967_v42 = vld [vmem:[#allocation6 + $0xa0] ss:$8 sps:$4 sm:$0xff]   ;;  %v4969_v44 = vld [vmem:[#allocation6 + $0xb4] ss:$8 sps:$4 sm:$0xff]  }
  0x46   :  { %774 = vmatpush1.bf16.msra.mxu0 %v4926_v15  ;;  %271 = vmatprep.subr.bf16.mxu1 %v4927_v16  ;;  %v4968_v43 = vld [vmem:[#allocation6 + $0x2a0] ss:$8 sps:$4 sm:$0xff]   ;;  %v4971_v45 = vld [vmem:[#allocation6 + $0x2b4] ss:$8 sps:$4 sm:$0xff]   ;;  %v4973_v46 = vld [vmem:[#allocation6 + $0xb0] ss:$8 sps:$4 sm:$0xff]  }
  0x47   :  { %775 = vmatprep.subr.bf16.mxu0 %v4929_v17  ;;  %v4974_v47 = vld [vmem:[#allocation6 + $0x2b0] ss:$8 sps:$4 sm:$0xff]   ;;  %v5852_v48 = vld [vmem:[#allocation3 + $0x4] ss:$8 sps:$4 sm:$0xff]   ;;  %v4975_v49 = vld [vmem:[#allocation6 + $0xc4] ss:$8 sps:$4 sm:$0xff]  }
  0x48   :  { %v4977_v50 = vld [vmem:[#allocation6 + $0x2c4] ss:$8 sps:$4 sm:$0xff]   ;;  %295 = vmatprep.mubr.bf16.mxu1 %v5852_v48  ;;  %799 = vmatprep.mubr.bf16.mxu0 %v5852_v48  ;;  %v4979_v51 = vld [vmem:[#allocation6 + $0xc0] ss:$8 sps:$4 sm:$0xff]   ;;  %v4981_v53 = vld [vmem:[#allocation6 + $0xd4] ss:$8 sps:$4 sm:$0xff]  }
  0x49   :  { %272 = vmatpush1.bf16.msra.mxu1 %v4931_v18  ;;  %v4980_v52 = vld [vmem:[#allocation6 + $0x2c0] ss:$8 sps:$4 sm:$0xff]   ;;  %v4983_v54 = vld [vmem:[#allocation6 + $0x2d4] ss:$8 sps:$4 sm:$0xff]   ;;  %v4985_v55 = vld [vmem:[#allocation6 + $0xd0] ss:$8 sps:$4 sm:$0xff]  }
  0x4a   :  { %776 = vmatpush1.bf16.msra.mxu0 %v4932_v19  ;;  %273 = vmatprep.subr.bf16.mxu1 %v4933_v20  ;;  %v4986_v56 = vld [vmem:[#allocation6 + $0x2d0] ss:$8 sps:$4 sm:$0xff]   ;;  %v4987_v57 = vld [vmem:[#allocation6 + $0xe4] ss:$8 sps:$4 sm:$0xff]   ;;  %v4991_v59 = vld [vmem:[#allocation6 + $0xe0] ss:$8 sps:$4 sm:$0xff]  }
  0x4b   :  { %777 = vmatprep.subr.bf16.mxu0 %v4935_v21  ;;  %v4989_v58 = vld [vmem:[#allocation6 + $0x2e4] ss:$8 sps:$4 sm:$0xff]   ;;  %v4992_v60 = vld [vmem:[#allocation6 + $0x2e0] ss:$8 sps:$4 sm:$0xff]   ;;  %v4993_v61 = vld [vmem:[#allocation6 + $0xf4] ss:$8 sps:$4 sm:$0xff]  }
  0x4c   :  { %v4995_v62 = vld [vmem:[#allocation6 + $0x2f4] ss:$8 sps:$4 sm:$0xff]   ;;  %v4997_v63 = vld [vmem:[#allocation6 + $0xf0] ss:$8 sps:$4 sm:$0xff]   ;;  %v5004_v1 = vld [vmem:[#allocation6 + $0x104] ss:$8 sps:$4 sm:$0xff]  }
  0x4d   :  { %274 = vmatpush1.bf16.msra.mxu1 %v4937_v22  ;;  %v4998_v0 = vld [vmem:[#allocation6 + $0x2f0] ss:$8 sps:$4 sm:$0xff]   ;;  %v5007_v2 = vld [vmem:[#allocation6 + $0x404] ss:$8 sps:$4 sm:$0xff]   ;;  %v5002_v4 = vld [vmem:[#allocation6 + $0x100] ss:$8 sps:$4 sm:$0xff]  }
  0x4e   :  { %778 = vmatpush1.bf16.msra.mxu0 %v4938_v23  ;;  %275 = vmatprep.subr.bf16.mxu1 %v4939_v24  ;;  %v5856_v3 = vld [vmem:[#allocation3] ss:$8 sps:$4 sm:$0xff]   ;;  %v5005_v5 = vld [vmem:[#allocation6 + $0x400] ss:$8 sps:$4 sm:$0xff]   ;;  %v5010_v6 = vld [vmem:[#allocation6 + $0x114] ss:$8 sps:$4 sm:$0xff]  }
  0x4f   :  { %779 = vmatprep.subr.bf16.mxu0 %v4941_v25  ;;  %v5013_v7 = vld [vmem:[#allocation6 + $0x414] ss:$8 sps:$4 sm:$0xff]   ;;  %v5008_v8 = vld [vmem:[#allocation6 + $0x110] ss:$8 sps:$4 sm:$0xff]   ;;  %v5016_v10 = vld [vmem:[#allocation6 + $0x124] ss:$8 sps:$4 sm:$0xff]  }
  0x50   :  { %v5011_v9 = vld [vmem:[#allocation6 + $0x410] ss:$8 sps:$4 sm:$0xff]   ;;  %v5019_v11 = vld [vmem:[#allocation6 + $0x424] ss:$8 sps:$4 sm:$0xff]   ;;  %v5014_v12 = vld [vmem:[#allocation6 + $0x120] ss:$8 sps:$4 sm:$0xff]  }
  0x51   :  { %276 = vmatpush1.bf16.msra.mxu1 %v4943_v26  ;;  %v5017_v13 = vld [vmem:[#allocation6 + $0x420] ss:$8 sps:$4 sm:$0xff]   ;;  %v5022_v14 = vld [vmem:[#allocation6 + $0x134] ss:$8 sps:$4 sm:$0xff]   ;;  %v5020_v16 = vld [vmem:[#allocation6 + $0x130] ss:$8 sps:$4 sm:$0xff]  }
  0x52   :  { %780 = vmatpush1.bf16.msra.mxu0 %v4944_v27  ;;  %277 = vmatprep.subr.bf16.mxu1 %v4945_v28  ;;  %v5025_v15 = vld [vmem:[#allocation6 + $0x434] ss:$8 sps:$4 sm:$0xff]   ;;  %v5023_v17 = vld [vmem:[#allocation6 + $0x430] ss:$8 sps:$4 sm:$0xff]   ;;  %v5028_v18 = vld [vmem:[#allocation6 + $0x144] ss:$8 sps:$4 sm:$0xff]  }
  0x53   :  { %781 = vmatprep.subr.bf16.mxu0 %v4947_v29  ;;  %v5031_v19 = vld [vmem:[#allocation6 + $0x444] ss:$8 sps:$4 sm:$0xff]   ;;  %v5026_v20 = vld [vmem:[#allocation6 + $0x140] ss:$8 sps:$4 sm:$0xff]   ;;  %v5034_v22 = vld [vmem:[#allocation6 + $0x154] ss:$8 sps:$4 sm:$0xff]  }
  0x54   :  { %v5029_v21 = vld [vmem:[#allocation6 + $0x440] ss:$8 sps:$4 sm:$0xff]   ;;  %v5037_v23 = vld [vmem:[#allocation6 + $0x454] ss:$8 sps:$4 sm:$0xff]   ;;  %v5032_v24 = vld [vmem:[#allocation6 + $0x150] ss:$8 sps:$4 sm:$0xff]  }
  0x55   :  { %278 = vmatpush1.bf16.msra.mxu1 %v4949_v30  ;;  %v5035_v25 = vld [vmem:[#allocation6 + $0x450] ss:$8 sps:$4 sm:$0xff]   ;;  %v5040_v26 = vld [vmem:[#allocation6 + $0x164] ss:$8 sps:$4 sm:$0xff]   ;;  %v5038_v28 = vld [vmem:[#allocation6 + $0x160] ss:$8 sps:$4 sm:$0xff]  }
  0x56   :  { %782 = vmatpush1.bf16.msra.mxu0 %v4950_v31  ;;  %279 = vmatprep.subr.bf16.mxu1 %v4951_v32  ;;  %v5043_v27 = vld [vmem:[#allocation6 + $0x464] ss:$8 sps:$4 sm:$0xff]   ;;  %v5041_v29 = vld [vmem:[#allocation6 + $0x460] ss:$8 sps:$4 sm:$0xff]   ;;  %v5046_v30 = vld [vmem:[#allocation6 + $0x174] ss:$8 sps:$4 sm:$0xff]  }
  0x57   :  { %783 = vmatprep.subr.bf16.mxu0 %v4953_v33  ;;  %v5049_v31 = vld [vmem:[#allocation6 + $0x474] ss:$8 sps:$4 sm:$0xff]   ;;  %v5044_v32 = vld [vmem:[#allocation6 + $0x170] ss:$8 sps:$4 sm:$0xff]  }
  0x58   :  { %v5047_v33 = vld [vmem:[#allocation6 + $0x470] ss:$8 sps:$4 sm:$0xff]  }
  0x59   :  { %280 = vmatpush1.bf16.msra.mxu1 %v4955_v34  ;;  %v5052_v34 = vld [vmem:[#allocation6 + $0x184] ss:$8 sps:$4 sm:$0xff]  }
  0x5a   :  { %784 = vmatpush1.bf16.msra.mxu0 %v4956_v35  ;;  %281 = vmatprep.subr.bf16.mxu1 %v4957_v36  ;;  %v5055_v35 = vld [vmem:[#allocation6 + $0x484] ss:$8 sps:$4 sm:$0xff]   ;;  %v5050_v36 = vld [vmem:[#allocation6 + $0x180] ss:$8 sps:$4 sm:$0xff]  }
  0x5b   :  { %785 = vmatprep.subr.bf16.mxu0 %v4959_v37  ;;  %v5053_v37 = vld [vmem:[#allocation6 + $0x480] ss:$8 sps:$4 sm:$0xff]  }
  0x5d   :  { %282 = vmatpush1.bf16.msra.mxu1 %v4961_v38  ;;  %v5058_v38 = vld [vmem:[#allocation6 + $0x194] ss:$8 sps:$4 sm:$0xff]  }
  0x5e   :  { %786 = vmatpush1.bf16.msra.mxu0 %v4962_v39  ;;  %283 = vmatprep.subr.bf16.mxu1 %v4963_v40  ;;  %v5061_v39 = vld [vmem:[#allocation6 + $0x494] ss:$8 sps:$4 sm:$0xff]   ;;  %v5056_v40 = vld [vmem:[#allocation6 + $0x190] ss:$8 sps:$4 sm:$0xff]  }
  0x5f   :  { %787 = vmatprep.subr.bf16.mxu0 %v4965_v41  ;;  %v5059_v41 = vld [vmem:[#allocation6 + $0x490] ss:$8 sps:$4 sm:$0xff]  }
  0x61   :  { %284 = vmatpush1.bf16.msra.mxu1 %v4967_v42  ;;  %v5064_v42 = vld [vmem:[#allocation6 + $0x1a4] ss:$8 sps:$4 sm:$0xff]  }
  0x62   :  { %788 = vmatpush1.bf16.msra.mxu0 %v4968_v43  ;;  %285 = vmatprep.subr.bf16.mxu1 %v4969_v44  ;;  %v5067_v43 = vld [vmem:[#allocation6 + $0x4a4] ss:$8 sps:$4 sm:$0xff]   ;;  %v5062_v44 = vld [vmem:[#allocation6 + $0x1a0] ss:$8 sps:$4 sm:$0xff]  }
  0x63   :  { %789 = vmatprep.subr.bf16.mxu0 %v4971_v45  ;;  %v5065_v45 = vld [vmem:[#allocation6 + $0x4a0] ss:$8 sps:$4 sm:$0xff]  }
  0x65   :  { %286 = vmatpush1.bf16.msra.mxu1 %v4973_v46  ;;  %v5070_v46 = vld [vmem:[#allocation6 + $0x1b4] ss:$8 sps:$4 sm:$0xff]  }
  0x66   :  { %790 = vmatpush1.bf16.msra.mxu0 %v4974_v47  ;;  %287 = vmatprep.subr.bf16.mxu1 %v4975_v49  ;;  %v5073_v47 = vld [vmem:[#allocation6 + $0x4b4] ss:$8 sps:$4 sm:$0xff]   ;;  %v5068_v49 = vld [vmem:[#allocation6 + $0x1b0] ss:$8 sps:$4 sm:$0xff]  }
  0x67   :  { %791 = vmatprep.subr.bf16.mxu0 %v4977_v50  ;;  %v5071_v50 = vld [vmem:[#allocation6 + $0x4b0] ss:$8 sps:$4 sm:$0xff]  }
  0x69   :  { %288 = vmatpush1.bf16.msra.mxu1 %v4979_v51  ;;  %v5076_v51 = vld [vmem:[#allocation6 + $0x1c4] ss:$8 sps:$4 sm:$0xff]  }
  0x6a   :  { %792 = vmatpush1.bf16.msra.mxu0 %v4980_v52  ;;  %289 = vmatprep.subr.bf16.mxu1 %v4981_v53  ;;  %v5079_v52 = vld [vmem:[#allocation6 + $0x4c4] ss:$8 sps:$4 sm:$0xff]   ;;  %v5074_v53 = vld [vmem:[#allocation6 + $0x1c0] ss:$8 sps:$4 sm:$0xff]  }
  0x6b   :  { %793 = vmatprep.subr.bf16.mxu0 %v4983_v54  ;;  %v5077_v54 = vld [vmem:[#allocation6 + $0x4c0] ss:$8 sps:$4 sm:$0xff]  }
  0x6d   :  { %290 = vmatpush1.bf16.msra.mxu1 %v4985_v55  ;;  %v5082_v55 = vld [vmem:[#allocation6 + $0x1d4] ss:$8 sps:$4 sm:$0xff]  }
  0x6e   :  { %794 = vmatpush1.bf16.msra.mxu0 %v4986_v56  ;;  %291 = vmatprep.subr.bf16.mxu1 %v4987_v57  ;;  %v5085_v56 = vld [vmem:[#allocation6 + $0x4d4] ss:$8 sps:$4 sm:$0xff]   ;;  %v5080_v57 = vld [vmem:[#allocation6 + $0x1d0] ss:$8 sps:$4 sm:$0xff]  }
  0x6f   :  { %795 = vmatprep.subr.bf16.mxu0 %v4989_v58  ;;  %v5083_v58 = vld [vmem:[#allocation6 + $0x4d0] ss:$8 sps:$4 sm:$0xff]  }
  0x71   :  { %292 = vmatpush1.bf16.msra.mxu1 %v4991_v59  ;;  %v5088_v59 = vld [vmem:[#allocation6 + $0x1e4] ss:$8 sps:$4 sm:$0xff]  }
  0x72   :  { %796 = vmatpush1.bf16.msra.mxu0 %v4992_v60  ;;  %293 = vmatprep.subr.bf16.mxu1 %v4993_v61  ;;  %v5091_v60 = vld [vmem:[#allocation6 + $0x4e4] ss:$8 sps:$4 sm:$0xff]   ;;  %v5086_v61 = vld [vmem:[#allocation6 + $0x1e0] ss:$8 sps:$4 sm:$0xff]  }
  0x73   :  { %797 = vmatprep.subr.bf16.mxu0 %v4995_v62  ;;  %v5089_v62 = vld [vmem:[#allocation6 + $0x4e0] ss:$8 sps:$4 sm:$0xff]  }
  0x75   :  { %294 = vmatpush1.bf16.msra.mxu1 %v4997_v63  ;;  %v5094_v63 = vld [vmem:[#allocation6 + $0x1f4] ss:$8 sps:$4 sm:$0xff]  }
  0x76   :  { %798 = vmatpush1.bf16.msra.mxu0 %v4998_v0  ;;  %515 = vmatprep.subr.bf16.mxu1 %v5004_v1  ;;  %v5097_v0 = vld [vmem:[#allocation6 + $0x4f4] ss:$8 sps:$4 sm:$0xff]   ;;  %v5092_v1 = vld [vmem:[#allocation6 + $0x1f0] ss:$8 sps:$4 sm:$0xff]  }
  0x77   :  { %1271 = vmatprep.subr.bf16.mxu0 %v5007_v2  ;;  %v5095_v2 = vld [vmem:[#allocation6 + $0x4f0] ss:$8 sps:$4 sm:$0xff]  }
  0x78   :  { %296 = vmatmul.mubr.bf16.vlgmr.msra.gmra.mrb[0].mxu1 %v5856_v3 }
  0x79   :  { %800 = vmatmul.mubr.bf16.vlgmr.msra.gmra.mrb[0].mxu0 %v5856_v3  ;;  %516 = vmatpush1.bf16.msra.mxu1 %v5002_v4  ;;  %v5100_v4 = vld [vmem:[#allocation6 + $0x304] ss:$8 sps:$4 sm:$0xff]  }
  0x7a   :  { %1272 = vmatpush1.bf16.msra.mxu0 %v5005_v5  ;;  %517 = vmatprep.subr.bf16.mxu1 %v5010_v6  ;;  %v5103_v5 = vld [vmem:[#allocation6 + $0x604] ss:$8 sps:$4 sm:$0xff]   ;;  %v5098_v6 = vld [vmem:[#allocation6 + $0x300] ss:$8 sps:$4 sm:$0xff]  }
  0x7b   :  { %1273 = vmatprep.subr.bf16.mxu0 %v5013_v7  ;;  %547 = vmatprep.mubr.bf16.mxu1 %v5852_v48  ;;  %v5101_v7 = vld [vmem:[#allocation6 + $0x600] ss:$8 sps:$4 sm:$0xff]  }
  0x7c   :  { %1303 = vmatprep.mubr.bf16.mxu0 %v5852_v48 }
  0x7d   :  { %518 = vmatpush1.bf16.msra.mxu1 %v5008_v8  ;;  %v5106_v8 = vld [vmem:[#allocation6 + $0x314] ss:$8 sps:$4 sm:$0xff]  }
  0x7e   :  { %1274 = vmatpush1.bf16.msra.mxu0 %v5011_v9  ;;  %519 = vmatprep.subr.bf16.mxu1 %v5016_v10  ;;  %v5109_v9 = vld [vmem:[#allocation6 + $0x614] ss:$8 sps:$4 sm:$0xff]   ;;  %v5104_v10 = vld [vmem:[#allocation6 + $0x310] ss:$8 sps:$4 sm:$0xff]  }
  0x7f   :  { %1275 = vmatprep.subr.bf16.mxu0 %v5019_v11  ;;  %v5107_v11 = vld [vmem:[#allocation6 + $0x610] ss:$8 sps:$4 sm:$0xff]  }
  0x81   :  { %520 = vmatpush1.bf16.msra.mxu1 %v5014_v12  ;;  %v5112_v12 = vld [vmem:[#allocation6 + $0x324] ss:$8 sps:$4 sm:$0xff]  }
  0x82   :  { %1276 = vmatpush1.bf16.msra.mxu0 %v5017_v13  ;;  %521 = vmatprep.subr.bf16.mxu1 %v5022_v14  ;;  %v5115_v13 = vld [vmem:[#allocation6 + $0x624] ss:$8 sps:$4 sm:$0xff]   ;;  %v5110_v14 = vld [vmem:[#allocation6 + $0x320] ss:$8 sps:$4 sm:$0xff]  }
  0x83   :  { %1277 = vmatprep.subr.bf16.mxu0 %v5025_v15  ;;  %v5113_v15 = vld [vmem:[#allocation6 + $0x620] ss:$8 sps:$4 sm:$0xff]  }
  0x85   :  { %522 = vmatpush1.bf16.msra.mxu1 %v5020_v16  ;;  %v5118_v16 = vld [vmem:[#allocation6 + $0x334] ss:$8 sps:$4 sm:$0xff]  }
  0x86   :  { %1278 = vmatpush1.bf16.msra.mxu0 %v5023_v17  ;;  %523 = vmatprep.subr.bf16.mxu1 %v5028_v18  ;;  %v5121_v17 = vld [vmem:[#allocation6 + $0x634] ss:$8 sps:$4 sm:$0xff]   ;;  %v5116_v18 = vld [vmem:[#allocation6 + $0x330] ss:$8 sps:$4 sm:$0xff]  }
  0x87   :  { %1279 = vmatprep.subr.bf16.mxu0 %v5031_v19  ;;  %v5119_v19 = vld [vmem:[#allocation6 + $0x630] ss:$8 sps:$4 sm:$0xff]  }
  0x89   :  { %524 = vmatpush1.bf16.msra.mxu1 %v5026_v20  ;;  %v5124_v20 = vld [vmem:[#allocation6 + $0x344] ss:$8 sps:$4 sm:$0xff]  }
  0x8a   :  { %1280 = vmatpush1.bf16.msra.mxu0 %v5029_v21  ;;  %525 = vmatprep.subr.bf16.mxu1 %v5034_v22  ;;  %v5127_v21 = vld [vmem:[#allocation6 + $0x644] ss:$8 sps:$4 sm:$0xff]   ;;  %v5122_v22 = vld [vmem:[#allocation6 + $0x340] ss:$8 sps:$4 sm:$0xff]  }
  0x8b   :  { %1281 = vmatprep.subr.bf16.mxu0 %v5037_v23  ;;  %v5125_v23 = vld [vmem:[#allocation6 + $0x640] ss:$8 sps:$4 sm:$0xff]  }
  0x8d   :  { %526 = vmatpush1.bf16.msra.mxu1 %v5032_v24  ;;  %v5133_v24 = vld [vmem:[#allocation6 + $0x654] ss:$8 sps:$4 sm:$0xff]  }
  0x8e   :  { %1282 = vmatpush1.bf16.msra.mxu0 %v5035_v25  ;;  %527 = vmatprep.subr.bf16.mxu1 %v5040_v26  ;;  %v5128_v25 = vld [vmem:[#allocation6 + $0x350] ss:$8 sps:$4 sm:$0xff]  }
  0x8f   :  { %1283 = vmatprep.subr.bf16.mxu0 %v5043_v27  ;;  %v5131_v26 = vld [vmem:[#allocation6 + $0x650] ss:$8 sps:$4 sm:$0xff]   ;;  %v5136_v27 = vld [vmem:[#allocation6 + $0x364] ss:$8 sps:$4 sm:$0xff]  }
  0x91   :  { %528 = vmatpush1.bf16.msra.mxu1 %v5038_v28  ;;  %v5139_v28 = vld [vmem:[#allocation6 + $0x664] ss:$8 sps:$4 sm:$0xff]  }
  0x92   :  { %1284 = vmatpush1.bf16.msra.mxu0 %v5041_v29  ;;  %529 = vmatprep.subr.bf16.mxu1 %v5046_v30  ;;  %v5134_v29 = vld [vmem:[#allocation6 + $0x360] ss:$8 sps:$4 sm:$0xff]  }
  0x93   :  { %1285 = vmatprep.subr.bf16.mxu0 %v5049_v31  ;;  %v5137_v30 = vld [vmem:[#allocation6 + $0x660] ss:$8 sps:$4 sm:$0xff]   ;;  %v5142_v31 = vld [vmem:[#allocation6 + $0x374] ss:$8 sps:$4 sm:$0xff]  }
  0x95   :  { %530 = vmatpush1.bf16.msra.mxu1 %v5044_v32  ;;  %v5145_v32 = vld [vmem:[#allocation6 + $0x674] ss:$8 sps:$4 sm:$0xff]  }
  0x96   :  { %1286 = vmatpush1.bf16.msra.mxu0 %v5047_v33  ;;  %531 = vmatprep.subr.bf16.mxu1 %v5052_v34  ;;  %v5140_v33 = vld [vmem:[#allocation6 + $0x370] ss:$8 sps:$4 sm:$0xff]  }
  0x97   :  { %1287 = vmatprep.subr.bf16.mxu0 %v5055_v35  ;;  %v5143_v34 = vld [vmem:[#allocation6 + $0x670] ss:$8 sps:$4 sm:$0xff]   ;;  %v5148_v35 = vld [vmem:[#allocation6 + $0x384] ss:$8 sps:$4 sm:$0xff]  }
  0x99   :  { %532 = vmatpush1.bf16.msra.mxu1 %v5050_v36  ;;  %v5151_v36 = vld [vmem:[#allocation6 + $0x684] ss:$8 sps:$4 sm:$0xff]  }
  0x9a   :  { %1288 = vmatpush1.bf16.msra.mxu0 %v5053_v37  ;;  %533 = vmatprep.subr.bf16.mxu1 %v5058_v38  ;;  %v5146_v37 = vld [vmem:[#allocation6 + $0x380] ss:$8 sps:$4 sm:$0xff]  }
  0x9b   :  { %1289 = vmatprep.subr.bf16.mxu0 %v5061_v39  ;;  %v5149_v38 = vld [vmem:[#allocation6 + $0x680] ss:$8 sps:$4 sm:$0xff]   ;;  %v5154_v39 = vld [vmem:[#allocation6 + $0x394] ss:$8 sps:$4 sm:$0xff]  }
  0x9d   :  { %534 = vmatpush1.bf16.msra.mxu1 %v5056_v40  ;;  %v5157_v40 = vld [vmem:[#allocation6 + $0x694] ss:$8 sps:$4 sm:$0xff]  }
  0x9e   :  { %1290 = vmatpush1.bf16.msra.mxu0 %v5059_v41  ;;  %535 = vmatprep.subr.bf16.mxu1 %v5064_v42  ;;  %v5152_v41 = vld [vmem:[#allocation6 + $0x390] ss:$8 sps:$4 sm:$0xff]  }
  0x9f   :  { %1291 = vmatprep.subr.bf16.mxu0 %v5067_v43  ;;  %v5155_v42 = vld [vmem:[#allocation6 + $0x690] ss:$8 sps:$4 sm:$0xff]   ;;  %v5160_v43 = vld [vmem:[#allocation6 + $0x3a4] ss:$8 sps:$4 sm:$0xff]  }
  0xa1   :  { %536 = vmatpush1.bf16.msra.mxu1 %v5062_v44  ;;  %v5163_v44 = vld [vmem:[#allocation6 + $0x6a4] ss:$8 sps:$4 sm:$0xff]  }
  0xa2   :  { %1292 = vmatpush1.bf16.msra.mxu0 %v5065_v45  ;;  %537 = vmatprep.subr.bf16.mxu1 %v5070_v46  ;;  %v5158_v45 = vld [vmem:[#allocation6 + $0x3a0] ss:$8 sps:$4 sm:$0xff]  }
  0xa3   :  { %1293 = vmatprep.subr.bf16.mxu0 %v5073_v47  ;;  %v5161_v46 = vld [vmem:[#allocation6 + $0x6a0] ss:$8 sps:$4 sm:$0xff]   ;;  %v5166_v47 = vld [vmem:[#allocation6 + $0x3b4] ss:$8 sps:$4 sm:$0xff]  }
  0xa5   :  { %538 = vmatpush1.bf16.msra.mxu1 %v5068_v49  ;;  %v5169_v49 = vld [vmem:[#allocation6 + $0x6b4] ss:$8 sps:$4 sm:$0xff]  }
  0xa6   :  { %1294 = vmatpush1.bf16.msra.mxu0 %v5071_v50  ;;  %539 = vmatprep.subr.bf16.mxu1 %v5076_v51  ;;  %v5164_v50 = vld [vmem:[#allocation6 + $0x3b0] ss:$8 sps:$4 sm:$0xff]  }
  0xa7   :  { %1295 = vmatprep.subr.bf16.mxu0 %v5079_v52  ;;  %v5167_v51 = vld [vmem:[#allocation6 + $0x6b0] ss:$8 sps:$4 sm:$0xff]   ;;  %v5172_v52 = vld [vmem:[#allocation6 + $0x3c4] ss:$8 sps:$4 sm:$0xff]  }
  0xa9   :  { %540 = vmatpush1.bf16.msra.mxu1 %v5074_v53  ;;  %v5175_v53 = vld [vmem:[#allocation6 + $0x6c4] ss:$8 sps:$4 sm:$0xff]  }
  0xaa   :  { %1296 = vmatpush1.bf16.msra.mxu0 %v5077_v54  ;;  %541 = vmatprep.subr.bf16.mxu1 %v5082_v55  ;;  %v5170_v54 = vld [vmem:[#allocation6 + $0x3c0] ss:$8 sps:$4 sm:$0xff]  }
  0xab   :  { %1297 = vmatprep.subr.bf16.mxu0 %v5085_v56  ;;  %v5173_v55 = vld [vmem:[#allocation6 + $0x6c0] ss:$8 sps:$4 sm:$0xff]   ;;  %v5178_v56 = vld [vmem:[#allocation6 + $0x3d4] ss:$8 sps:$4 sm:$0xff]  }
  0xad   :  { %542 = vmatpush1.bf16.msra.mxu1 %v5080_v57  ;;  %v5181_v57 = vld [vmem:[#allocation6 + $0x6d4] ss:$8 sps:$4 sm:$0xff]  }
  0xae   :  { %1298 = vmatpush1.bf16.msra.mxu0 %v5083_v58  ;;  %543 = vmatprep.subr.bf16.mxu1 %v5088_v59  ;;  %v5176_v58 = vld [vmem:[#allocation6 + $0x3d0] ss:$8 sps:$4 sm:$0xff]  }
  0xaf   :  { %1299 = vmatprep.subr.bf16.mxu0 %v5091_v60  ;;  %v5179_v59 = vld [vmem:[#allocation6 + $0x6d0] ss:$8 sps:$4 sm:$0xff]   ;;  %v5184_v60 = vld [vmem:[#allocation6 + $0x3e4] ss:$8 sps:$4 sm:$0xff]  }
  0xb1   :  { %544 = vmatpush1.bf16.msra.mxu1 %v5086_v61  ;;  %v5187_v61 = vld [vmem:[#allocation6 + $0x6e4] ss:$8 sps:$4 sm:$0xff]  }
  0xb2   :  { %1300 = vmatpush1.bf16.msra.mxu0 %v5089_v62  ;;  %545 = vmatprep.subr.bf16.mxu1 %v5094_v63  ;;  %v5182_v62 = vld [vmem:[#allocation6 + $0x3e0] ss:$8 sps:$4 sm:$0xff]  }
  0xb3   :  { %1301 = vmatprep.subr.bf16.mxu0 %v5097_v0  ;;  %v5185_v63 = vld [vmem:[#allocation6 + $0x6e0] ss:$8 sps:$4 sm:$0xff]   ;;  %v5190_v0 = vld [vmem:[#allocation6 + $0x3f4] ss:$8 sps:$4 sm:$0xff]  }
  0xb5   :  { %546 = vmatpush1.bf16.msra.mxu1 %v5092_v1  ;;  %v5193_v1 = vld [vmem:[#allocation6 + $0x6f4] ss:$8 sps:$4 sm:$0xff]  }
  0xb6   :  { %1302 = vmatpush1.bf16.msra.mxu0 %v5095_v2  ;;  %1019 = vmatprep.subr.bf16.mxu1 %v5100_v4  ;;  %v5188_v2 = vld [vmem:[#allocation6 + $0x3f0] ss:$8 sps:$4 sm:$0xff]  }
  0xb7   :  { %1775 = vmatprep.subr.bf16.mxu0 %v5103_v5  ;;  %v5191_v4 = vld [vmem:[#allocation6 + $0x6f0] ss:$8 sps:$4 sm:$0xff]   ;;  %v5196_v5 = vld [vmem:[#allocation6 + $0x504] ss:$8 sps:$4 sm:$0xff]  }
  0xb8   :  { %548 = vmatmul.mubr.bf16.vlgmr.msra.gmra.mrb[4].mxu1 %v5856_v3 }
  0xb9   :  { %1304 = vmatmul.mubr.bf16.vlgmr.msra.gmra.mrb[4].mxu0 %v5856_v3  ;;  %1020 = vmatpush1.bf16.msra.mxu1 %v5098_v6  ;;  %v5199_v6 = vld [vmem:[#allocation6 + $0x804] ss:$8 sps:$4 sm:$0xff]  }
  0xba   :  { %1776 = vmatpush1.bf16.msra.mxu0 %v5101_v7  ;;  %1021 = vmatprep.subr.bf16.mxu1 %v5106_v8  ;;  %v5194_v7 = vld [vmem:[#allocation6 + $0x500] ss:$8 sps:$4 sm:$0xff]  }
  0xbb   :  { %1777 = vmatprep.subr.bf16.mxu0 %v5109_v9  ;;  %1051 = vmatprep.mubr.bf16.mxu1 %v5852_v48  ;;  %v5197_v8 = vld [vmem:[#allocation6 + $0x800] ss:$8 sps:$4 sm:$0xff]   ;;  %v5202_v9 = vld [vmem:[#allocation6 + $0x514] ss:$8 sps:$4 sm:$0xff]  }
  0xbc   :  { %1807 = vmatprep.mubr.bf16.mxu0 %v5852_v48  ;;  %v5130_v48 = vld [vmem:[#allocation6 + $0x354] ss:$8 sps:$4 sm:$0xff]  }
  0xbd   :  { %1022 = vmatpush1.bf16.msra.mxu1 %v5104_v10  ;;  %v5205_v10 = vld [vmem:[#allocation6 + $0x814] ss:$8 sps:$4 sm:$0xff]  }
  0xbe   :  { %1778 = vmatpush1.bf16.msra.mxu0 %v5107_v11  ;;  %1023 = vmatprep.subr.bf16.mxu1 %v5112_v12  ;;  %v5866_v11 = vld [vmem:[#allocation3 + $0x4] ss:$8 sps:$4 sm:$0xff]   ;;  %v5200_v12 = vld [vmem:[#allocation6 + $0x510] ss:$8 sps:$4 sm:$0xff]  }
  0xbf   :  { %1779 = vmatprep.subr.bf16.mxu0 %v5115_v13  ;;  %v5203_v13 = vld [vmem:[#allocation6 + $0x810] ss:$8 sps:$4 sm:$0xff]  }
  0xc1   :  { %1024 = vmatpush1.bf16.msra.mxu1 %v5110_v14  ;;  %v5208_v14 = vld [vmem:[#allocation6 + $0x524] ss:$8 sps:$4 sm:$0xff]  }
  0xc2   :  { %1780 = vmatpush1.bf16.msra.mxu0 %v5113_v15  ;;  %1025 = vmatprep.subr.bf16.mxu1 %v5118_v16  ;;  %v5211_v15 = vld [vmem:[#allocation6 + $0x824] ss:$8 sps:$4 sm:$0xff]   ;;  %v5206_v16 = vld [vmem:[#allocation6 + $0x520] ss:$8 sps:$4 sm:$0xff]  }
  0xc3   :  { %1781 = vmatprep.subr.bf16.mxu0 %v5121_v17  ;;  %v5209_v17 = vld [vmem:[#allocation6 + $0x820] ss:$8 sps:$4 sm:$0xff]  }
  0xc5   :  { %1026 = vmatpush1.bf16.msra.mxu1 %v5116_v18  ;;  %v5214_v18 = vld [vmem:[#allocation6 + $0x534] ss:$8 sps:$4 sm:$0xff]  }
  0xc6   :  { %1782 = vmatpush1.bf16.msra.mxu0 %v5119_v19  ;;  %1027 = vmatprep.subr.bf16.mxu1 %v5124_v20  ;;  %v5212_v19 = vld [vmem:[#allocation6 + $0x530] ss:$8 sps:$4 sm:$0xff]  }
  0xc7   :  { %1783 = vmatprep.subr.bf16.mxu0 %v5127_v21  ;;  %v5215_v20 = vld [vmem:[#allocation6 + $0x830] ss:$8 sps:$4 sm:$0xff]   ;;  %v5220_v21 = vld [vmem:[#allocation6 + $0x544] ss:$8 sps:$4 sm:$0xff]  }
  0xc9   :  { %1028 = vmatpush1.bf16.msra.mxu1 %v5122_v22  ;;  %v5223_v22 = vld [vmem:[#allocation6 + $0x844] ss:$8 sps:$4 sm:$0xff]  }
  0xca   :  { %1784 = vmatpush1.bf16.msra.mxu0 %v5125_v23  ;;  %1029 = vmatprep.subr.bf16.mxu1 %v5130_v48  ;;  %v5218_v23 = vld [vmem:[#allocation6 + $0x540] ss:$8 sps:$4 sm:$0xff]  }
  0xcb   :  { %1785 = vmatprep.subr.bf16.mxu0 %v5133_v24  ;;  %v5221_v48 = vld [vmem:[#allocation6 + $0x840] ss:$8 sps:$4 sm:$0xff]   ;;  %v5226_v24 = vld [vmem:[#allocation6 + $0x554] ss:$8 sps:$4 sm:$0xff]  }
  0xcd   :  { %1030 = vmatpush1.bf16.msra.mxu1 %v5128_v25  ;;  %v5229_v25 = vld [vmem:[#allocation6 + $0x854] ss:$8 sps:$4 sm:$0xff]  }
  0xce   :  { %1786 = vmatpush1.bf16.msra.mxu0 %v5131_v26  ;;  %1031 = vmatprep.subr.bf16.mxu1 %v5136_v27  ;;  %v5224_v26 = vld [vmem:[#allocation6 + $0x550] ss:$8 sps:$4 sm:$0xff]  }
  0xcf   :  { %1787 = vmatprep.subr.bf16.mxu0 %v5139_v28  ;;  %v5227_v27 = vld [vmem:[#allocation6 + $0x850] ss:$8 sps:$4 sm:$0xff]   ;;  %v5232_v28 = vld [vmem:[#allocation6 + $0x564] ss:$8 sps:$4 sm:$0xff]  }
  0xd1   :  { %1032 = vmatpush1.bf16.msra.mxu1 %v5134_v29  ;;  %v5235_v29 = vld [vmem:[#allocation6 + $0x864] ss:$8 sps:$4 sm:$0xff]  }
  0xd2   :  { %1788 = vmatpush1.bf16.msra.mxu0 %v5137_v30  ;;  %1033 = vmatprep.subr.bf16.mxu1 %v5142_v31  ;;  %v5230_v30 = vld [vmem:[#allocation6 + $0x560] ss:$8 sps:$4 sm:$0xff]  }
  0xd3   :  { %1789 = vmatprep.subr.bf16.mxu0 %v5145_v32  ;;  %v5233_v31 = vld [vmem:[#allocation6 + $0x860] ss:$8 sps:$4 sm:$0xff]   ;;  %v5238_v32 = vld [vmem:[#allocation6 + $0x574] ss:$8 sps:$4 sm:$0xff]  }
  0xd5   :  { %1034 = vmatpush1.bf16.msra.mxu1 %v5140_v33  ;;  %v5241_v33 = vld [vmem:[#allocation6 + $0x874] ss:$8 sps:$4 sm:$0xff]  }
  0xd6   :  { %1790 = vmatpush1.bf16.msra.mxu0 %v5143_v34  ;;  %1035 = vmatprep.subr.bf16.mxu1 %v5148_v35  ;;  %v5236_v34 = vld [vmem:[#allocation6 + $0x570] ss:$8 sps:$4 sm:$0xff]  }
  0xd7   :  { %1791 = vmatprep.subr.bf16.mxu0 %v5151_v36  ;;  %v5239_v35 = vld [vmem:[#allocation6 + $0x870] ss:$8 sps:$4 sm:$0xff]   ;;  %v5244_v36 = vld [vmem:[#allocation6 + $0x584] ss:$8 sps:$4 sm:$0xff]  }
  0xd9   :  { %1036 = vmatpush1.bf16.msra.mxu1 %v5146_v37  ;;  %v5247_v37 = vld [vmem:[#allocation6 + $0x884] ss:$8 sps:$4 sm:$0xff]  }
  0xda   :  { %1792 = vmatpush1.bf16.msra.mxu0 %v5149_v38  ;;  %1037 = vmatprep.subr.bf16.mxu1 %v5154_v39  ;;  %v5242_v38 = vld [vmem:[#allocation6 + $0x580] ss:$8 sps:$4 sm:$0xff]  }
  0xdb   :  { %1793 = vmatprep.subr.bf16.mxu0 %v5157_v40  ;;  %v5245_v39 = vld [vmem:[#allocation6 + $0x880] ss:$8 sps:$4 sm:$0xff]   ;;  %v5250_v40 = vld [vmem:[#allocation6 + $0x594] ss:$8 sps:$4 sm:$0xff]  }
  0xdd   :  { %1038 = vmatpush1.bf16.msra.mxu1 %v5152_v41  ;;  %v5253_v41 = vld [vmem:[#allocation6 + $0x894] ss:$8 sps:$4 sm:$0xff]  }
  0xde   :  { %1794 = vmatpush1.bf16.msra.mxu0 %v5155_v42  ;;  %1039 = vmatprep.subr.bf16.mxu1 %v5160_v43  ;;  %v5248_v42 = vld [vmem:[#allocation6 + $0x590] ss:$8 sps:$4 sm:$0xff]  }
  0xdf   :  { %1795 = vmatprep.subr.bf16.mxu0 %v5163_v44  ;;  %v5251_v43 = vld [vmem:[#allocation6 + $0x890] ss:$8 sps:$4 sm:$0xff]   ;;  %v5256_v44 = vld [vmem:[#allocation6 + $0x5a4] ss:$8 sps:$4 sm:$0xff]  }
  0xe1   :  { %1040 = vmatpush1.bf16.msra.mxu1 %v5158_v45  ;;  %v5259_v45 = vld [vmem:[#allocation6 + $0x8a4] ss:$8 sps:$4 sm:$0xff]  }
  0xe2   :  { %1796 = vmatpush1.bf16.msra.mxu0 %v5161_v46  ;;  %1041 = vmatprep.subr.bf16.mxu1 %v5166_v47  ;;  %v5254_v46 = vld [vmem:[#allocation6 + $0x5a0] ss:$8 sps:$4 sm:$0xff]  }
  0xe3   :  { %1797 = vmatprep.subr.bf16.mxu0 %v5169_v49  ;;  %v5257_v47 = vld [vmem:[#allocation6 + $0x8a0] ss:$8 sps:$4 sm:$0xff]   ;;  %v5262_v49 = vld [vmem:[#allocation6 + $0x5b4] ss:$8 sps:$4 sm:$0xff]  }
  0xe5   :  { %1042 = vmatpush1.bf16.msra.mxu1 %v5164_v50  ;;  %v5265_v50 = vld [vmem:[#allocation6 + $0x8b4] ss:$8 sps:$4 sm:$0xff]  }
  0xe6   :  { %1798 = vmatpush1.bf16.msra.mxu0 %v5167_v51  ;;  %1043 = vmatprep.subr.bf16.mxu1 %v5172_v52  ;;  %v5260_v51 = vld [vmem:[#allocation6 + $0x5b0] ss:$8 sps:$4 sm:$0xff]  }
  0xe7   :  { %1799 = vmatprep.subr.bf16.mxu0 %v5175_v53  ;;  %v5263_v52 = vld [vmem:[#allocation6 + $0x8b0] ss:$8 sps:$4 sm:$0xff]   ;;  %v5268_v53 = vld [vmem:[#allocation6 + $0x5c4] ss:$8 sps:$4 sm:$0xff]  }
  0xe9   :  { %1044 = vmatpush1.bf16.msra.mxu1 %v5170_v54  ;;  %v5271_v54 = vld [vmem:[#allocation6 + $0x8c4] ss:$8 sps:$4 sm:$0xff]  }
  0xea   :  { %1800 = vmatpush1.bf16.msra.mxu0 %v5173_v55  ;;  %1045 = vmatprep.subr.bf16.mxu1 %v5178_v56  ;;  %v5266_v55 = vld [vmem:[#allocation6 + $0x5c0] ss:$8 sps:$4 sm:$0xff]  }
  0xeb   :  { %1801 = vmatprep.subr.bf16.mxu0 %v5181_v57  ;;  %v5269_v56 = vld [vmem:[#allocation6 + $0x8c0] ss:$8 sps:$4 sm:$0xff]   ;;  %v5274_v57 = vld [vmem:[#allocation6 + $0x5d4] ss:$8 sps:$4 sm:$0xff]  }
  0xed   :  { %1046 = vmatpush1.bf16.msra.mxu1 %v5176_v58  ;;  %v5277_v58 = vld [vmem:[#allocation6 + $0x8d4] ss:$8 sps:$4 sm:$0xff]  }
  0xee   :  { %1802 = vmatpush1.bf16.msra.mxu0 %v5179_v59  ;;  %1047 = vmatprep.subr.bf16.mxu1 %v5184_v60  ;;  %v5272_v59 = vld [vmem:[#allocation6 + $0x5d0] ss:$8 sps:$4 sm:$0xff]  }
  0xef   :  { %1803 = vmatprep.subr.bf16.mxu0 %v5187_v61  ;;  %v5275_v60 = vld [vmem:[#allocation6 + $0x8d0] ss:$8 sps:$4 sm:$0xff]   ;;  %v5280_v61 = vld [vmem:[#allocation6 + $0x5e4] ss:$8 sps:$4 sm:$0xff]  }
  0xf1   :  { %1048 = vmatpush1.bf16.msra.mxu1 %v5182_v62  ;;  %v5283_v62 = vld [vmem:[#allocation6 + $0x8e4] ss:$8 sps:$4 sm:$0xff]  }
  0xf2   :  { %1804 = vmatpush1.bf16.msra.mxu0 %v5185_v63  ;;  %1049 = vmatprep.subr.bf16.mxu1 %v5190_v0  ;;  %v5278_v63 = vld [vmem:[#allocation6 + $0x5e0] ss:$8 sps:$4 sm:$0xff]  }
  0xf3   :  { %1805 = vmatprep.subr.bf16.mxu0 %v5193_v1  ;;  %v5281_v0 = vld [vmem:[#allocation6 + $0x8e0] ss:$8 sps:$4 sm:$0xff]   ;;  %v5286_v1 = vld [vmem:[#allocation6 + $0x5f4] ss:$8 sps:$4 sm:$0xff]  }
  0xf5   :  { %1050 = vmatpush1.bf16.msra.mxu1 %v5188_v2  ;;  %v5289_v2 = vld [vmem:[#allocation6 + $0x8f4] ss:$8 sps:$4 sm:$0xff]  }
  0xf6   :  { %1806 = vmatpush1.bf16.msra.mxu0 %v5191_v4  ;;  %1523 = vmatprep.subr.bf16.mxu1 %v5196_v5  ;;  %v5284_v4 = vld [vmem:[#allocation6 + $0x5f0] ss:$8 sps:$4 sm:$0xff]  }
  0xf7   :  { %2279 = vmatprep.subr.bf16.mxu0 %v5199_v6  ;;  %v5287_v5 = vld [vmem:[#allocation6 + $0x8f0] ss:$8 sps:$4 sm:$0xff]   ;;  %v5295_v6 = vld [vmem:[#allocation6 + $0x704] ss:$8 sps:$4 sm:$0xff]  }
  0xf8   :  { %1052 = vmatmul.mubr.bf16.vlgmr.msra.gmra.mrb[8].mxu1 %v5856_v3 }
  0xf9   :  { %1808 = vmatmul.mubr.bf16.vlgmr.msra.gmra.mrb[8].mxu0 %v5856_v3  ;;  %1524 = vmatpush1.bf16.msra.mxu1 %v5194_v7  ;;  %v5217_v3 = vld [vmem:[#allocation6 + $0x834] ss:$8 sps:$4 sm:$0xff]   ;;  %v5298_v7 = vld [vmem:[#allocation6 + $0xa04] ss:$8 sps:$4 sm:$0xff]  }
  0xfa   :  { %2280 = vmatpush1.bf16.msra.mxu0 %v5197_v8  ;;  %1525 = vmatprep.subr.bf16.mxu1 %v5202_v9  ;;  %v5872_v8 = vld [vmem:[#allocation3] ss:$8 sps:$4 sm:$0xff]   ;;  %v5293_v9 = vld [vmem:[#allocation6 + $0x700] ss:$8 sps:$4 sm:$0xff]  }
  0xfb   :  { %2281 = vmatprep.subr.bf16.mxu0 %v5205_v10  ;;  %1555 = vmatprep.mubr.bf16.mxu1 %v5866_v11  ;;  %v5296_v10 = vld [vmem:[#allocation6 + $0xa00] ss:$8 sps:$4 sm:$0xff]  }
  0xfc   :  { %2311 = vmatprep.mubr.bf16.mxu0 %v5866_v11 }
  0xfd   :  { %1526 = vmatpush1.bf16.msra.mxu1 %v5200_v12  ;;  %v5301_v12 = vld [vmem:[#allocation6 + $0x714] ss:$8 sps:$4 sm:$0xff]  }
  0xfe   :  { %2282 = vmatpush1.bf16.msra.mxu0 %v5203_v13  ;;  %1527 = vmatprep.subr.bf16.mxu1 %v5208_v14  ;;  %v5304_v13 = vld [vmem:[#allocation6 + $0xa14] ss:$8 sps:$4 sm:$0xff]   ;;  %v5299_v14 = vld [vmem:[#allocation6 + $0x710] ss:$8 sps:$4 sm:$0xff]  }
  0xff   :  { %2283 = vmatprep.subr.bf16.mxu0 %v5211_v15  ;;  %v5302_v15 = vld [vmem:[#allocation6 + $0xa10] ss:$8 sps:$4 sm:$0xff]  }
 0x101   :  { %1528 = vmatpush1.bf16.msra.mxu1 %v5206_v16  ;;  %v5307_v16 = vld [vmem:[#allocation6 + $0x724] ss:$8 sps:$4 sm:$0xff]  }
 0x102   :  { %2284 = vmatpush1.bf16.msra.mxu0 %v5209_v17  ;;  %1529 = vmatprep.subr.bf16.mxu1 %v5214_v18  ;;  %v5310_v17 = vld [vmem:[#allocation6 + $0xa24] ss:$8 sps:$4 sm:$0xff]   ;;  %v5305_v18 = vld [vmem:[#allocation6 + $0x720] ss:$8 sps:$4 sm:$0xff]  }
 0x103   :  { %2285 = vmatprep.subr.bf16.mxu0 %v5217_v3  ;;  %v5308_v3 = vld [vmem:[#allocation6 + $0xa20] ss:$8 sps:$4 sm:$0xff]  }
 0x105   :  { %1530 = vmatpush1.bf16.msra.mxu1 %v5212_v19  ;;  %v5313_v19 = vld [vmem:[#allocation6 + $0x734] ss:$8 sps:$4 sm:$0xff]  }
 0x106   :  { %2286 = vmatpush1.bf16.msra.mxu0 %v5215_v20  ;;  %1531 = vmatprep.subr.bf16.mxu1 %v5220_v21  ;;  %v5316_v20 = vld [vmem:[#allocation6 + $0xa34] ss:$8 sps:$4 sm:$0xff]   ;;  %v5311_v21 = vld [vmem:[#allocation6 + $0x730] ss:$8 sps:$4 sm:$0xff]  }
 0x107   :  { %2287 = vmatprep.subr.bf16.mxu0 %v5223_v22  ;;  %v5314_v22 = vld [vmem:[#allocation6 + $0xa30] ss:$8 sps:$4 sm:$0xff]  }
 0x109   :  { %1532 = vmatpush1.bf16.msra.mxu1 %v5218_v23  ;;  %v5319_v23 = vld [vmem:[#allocation6 + $0x744] ss:$8 sps:$4 sm:$0xff]  }
 0x10a   :  { %2288 = vmatpush1.bf16.msra.mxu0 %v5221_v48  ;;  %1533 = vmatprep.subr.bf16.mxu1 %v5226_v24  ;;  %v5322_v48 = vld [vmem:[#allocation6 + $0xa44] ss:$8 sps:$4 sm:$0xff]   ;;  %v5317_v24 = vld [vmem:[#allocation6 + $0x740] ss:$8 sps:$4 sm:$0xff]  }
 0x10b   :  { %2289 = vmatprep.subr.bf16.mxu0 %v5229_v25  ;;  %v5325_v25 = vld [vmem:[#allocation6 + $0x754] ss:$8 sps:$4 sm:$0xff]  }
 0x10d   :  { %1534 = vmatpush1.bf16.msra.mxu1 %v5224_v26  ;;  %v5328_v26 = vld [vmem:[#allocation6 + $0xa54] ss:$8 sps:$4 sm:$0xff]  }
 0x10e   :  { %2290 = vmatpush1.bf16.msra.mxu0 %v5227_v27  ;;  %1535 = vmatprep.subr.bf16.mxu1 %v5232_v28  ;;  %v5323_v27 = vld [vmem:[#allocation6 + $0x750] ss:$8 sps:$4 sm:$0xff]  }
 0x10f   :  { %2291 = vmatprep.subr.bf16.mxu0 %v5235_v29  ;;  %v5326_v28 = vld [vmem:[#allocation6 + $0xa50] ss:$8 sps:$4 sm:$0xff]   ;;  %v5331_v29 = vld [vmem:[#allocation6 + $0x764] ss:$8 sps:$4 sm:$0xff]  }
 0x111   :  { %1536 = vmatpush1.bf16.msra.mxu1 %v5230_v30  ;;  %v5334_v30 = vld [vmem:[#allocation6 + $0xa64] ss:$8 sps:$4 sm:$0xff]  }
 0x112   :  { %2292 = vmatpush1.bf16.msra.mxu0 %v5233_v31  ;;  %1537 = vmatprep.subr.bf16.mxu1 %v5238_v32  ;;  %v5329_v32 = vld [vmem:[#allocation6 + $0x760] ss:$8 sps:$4 sm:$0xff]  }
 0x113   :  { %2293 = vmatprep.subr.bf16.mxu0 %v5241_v33  ;;  %v5332_v33 = vld [vmem:[#allocation6 + $0xa60] ss:$8 sps:$4 sm:$0xff]  }
 0x115   :  { %1538 = vmatpush1.bf16.msra.mxu1 %v5236_v34 }
 0x116   :  { %2294 = vmatpush1.bf16.msra.mxu0 %v5239_v35  ;;  %1539 = vmatprep.subr.bf16.mxu1 %v5244_v36 }
 0x117   :  { %2295 = vmatprep.subr.bf16.mxu0 %v5247_v37 }
 0x119   :  { %1540 = vmatpush1.bf16.msra.mxu1 %v5242_v38 }
 0x11a   :  { %2296 = vmatpush1.bf16.msra.mxu0 %v5245_v39  ;;  %1541 = vmatprep.subr.bf16.mxu1 %v5250_v40 }
 0x11b   :  { %2297 = vmatprep.subr.bf16.mxu0 %v5253_v41  ;;  %v5337_v41 = vld [vmem:[#allocation6 + $0x774] ss:$8 sps:$4 sm:$0xff]  }
 0x11d   :  { %1542 = vmatpush1.bf16.msra.mxu1 %v5248_v42  ;;  %v5340_v42 = vld [vmem:[#allocation6 + $0xa74] ss:$8 sps:$4 sm:$0xff]  }
 0x11e   :  { %2298 = vmatpush1.bf16.msra.mxu0 %v5251_v43  ;;  %1543 = vmatprep.subr.bf16.mxu1 %v5256_v44 }
 0x11f   :  { %2299 = vmatprep.subr.bf16.mxu0 %v5259_v45 }
 0x121   :  { %1544 = vmatpush1.bf16.msra.mxu1 %v5254_v46 }
 0x122   :  { %2300 = vmatpush1.bf16.msra.mxu0 %v5257_v47  ;;  %1545 = vmatprep.subr.bf16.mxu1 %v5262_v49  ;;  %v5335_v47 = vld [vmem:[#allocation6 + $0x770] ss:$8 sps:$4 sm:$0xff]  }
 0x123   :  { %2301 = vmatprep.subr.bf16.mxu0 %v5265_v50  ;;  %v5338_v49 = vld [vmem:[#allocation6 + $0xa70] ss:$8 sps:$4 sm:$0xff]   ;;  %v5343_v50 = vld [vmem:[#allocation6 + $0x784] ss:$8 sps:$4 sm:$0xff]  }
 0x125   :  { %1546 = vmatpush1.bf16.msra.mxu1 %v5260_v51  ;;  %v5346_v51 = vld [vmem:[#allocation6 + $0xa84] ss:$8 sps:$4 sm:$0xff]  }
 0x126   :  { %2302 = vmatpush1.bf16.msra.mxu0 %v5263_v52  ;;  %1547 = vmatprep.subr.bf16.mxu1 %v5268_v53  ;;  %v5341_v52 = vld [vmem:[#allocation6 + $0x780] ss:$8 sps:$4 sm:$0xff]  }
 0x127   :  { %2303 = vmatprep.subr.bf16.mxu0 %v5271_v54  ;;  %v5344_v53 = vld [vmem:[#allocation6 + $0xa80] ss:$8 sps:$4 sm:$0xff]   ;;  %v5349_v54 = vld [vmem:[#allocation6 + $0x794] ss:$8 sps:$4 sm:$0xff]  }
 0x129   :  { %1548 = vmatpush1.bf16.msra.mxu1 %v5266_v55  ;;  %v5352_v55 = vld [vmem:[#allocation6 + $0xa94] ss:$8 sps:$4 sm:$0xff]  }
 0x12a   :  { %2304 = vmatpush1.bf16.msra.mxu0 %v5269_v56  ;;  %1549 = vmatprep.subr.bf16.mxu1 %v5274_v57  ;;  %v5347_v56 = vld [vmem:[#allocation6 + $0x790] ss:$8 sps:$4 sm:$0xff]  }
 0x12b   :  { %2305 = vmatprep.subr.bf16.mxu0 %v5277_v58  ;;  %v5350_v57 = vld [vmem:[#allocation6 + $0xa90] ss:$8 sps:$4 sm:$0xff]   ;;  %v5355_v58 = vld [vmem:[#allocation6 + $0x7a4] ss:$8 sps:$4 sm:$0xff]  }
 0x12d   :  { %1550 = vmatpush1.bf16.msra.mxu1 %v5272_v59  ;;  %v5358_v59 = vld [vmem:[#allocation6 + $0xaa4] ss:$8 sps:$4 sm:$0xff]  }
 0x12e   :  { %2306 = vmatpush1.bf16.msra.mxu0 %v5275_v60  ;;  %1551 = vmatprep.subr.bf16.mxu1 %v5280_v61  ;;  %v5353_v60 = vld [vmem:[#allocation6 + $0x7a0] ss:$8 sps:$4 sm:$0xff]  }
 0x12f   :  { %2307 = vmatprep.subr.bf16.mxu0 %v5283_v62  ;;  %v5356_v61 = vld [vmem:[#allocation6 + $0xaa0] ss:$8 sps:$4 sm:$0xff]   ;;  %v5361_v62 = vld [vmem:[#allocation6 + $0x7b4] ss:$8 sps:$4 sm:$0xff]  }
 0x131   :  { %1552 = vmatpush1.bf16.msra.mxu1 %v5278_v63  ;;  %v5364_v63 = vld [vmem:[#allocation6 + $0xab4] ss:$8 sps:$4 sm:$0xff]  }
 0x132   :  { %2308 = vmatpush1.bf16.msra.mxu0 %v5281_v0  ;;  %1553 = vmatprep.subr.bf16.mxu1 %v5286_v1  ;;  %v5359_v0 = vld [vmem:[#allocation6 + $0x7b0] ss:$8 sps:$4 sm:$0xff]  }
 0x133   :  { %2309 = vmatprep.subr.bf16.mxu0 %v5289_v2  ;;  %v5362_v1 = vld [vmem:[#allocation6 + $0xab0] ss:$8 sps:$4 sm:$0xff]   ;;  %v5367_v2 = vld [vmem:[#allocation6 + $0x7c4] ss:$8 sps:$4 sm:$0xff]  }
 0x135   :  { %1554 = vmatpush1.bf16.msra.mxu1 %v5284_v4  ;;  %v5370_v4 = vld [vmem:[#allocation6 + $0xac4] ss:$8 sps:$4 sm:$0xff]  }
 0x136   :  { %2310 = vmatpush1.bf16.msra.mxu0 %v5287_v5  ;;  %2027 = vmatprep.subr.bf16.mxu1 %v5295_v6  ;;  %v5365_v5 = vld [vmem:[#allocation6 + $0x7c0] ss:$8 sps:$4 sm:$0xff]  }
 0x137   :  { %2783 = vmatprep.subr.bf16.mxu0 %v5298_v7  ;;  %v5368_v6 = vld [vmem:[#allocation6 + $0xac0] ss:$8 sps:$4 sm:$0xff]   ;;  %v5373_v7 = vld [vmem:[#allocation6 + $0x7d4] ss:$8 sps:$4 sm:$0xff]  }
 0x138   :  { %1556 = vmatmul.mubr.bf16.vlgmr.msra.gmra.mrb[12].mxu1 %v5872_v8 }
 0x139   :  { %2312 = vmatmul.mubr.bf16.vlgmr.msra.gmra.mrb[12].mxu0 %v5872_v8  ;;  %2028 = vmatpush1.bf16.msra.mxu1 %v5293_v9  ;;  %v5376_v9 = vld [vmem:[#allocation6 + $0xad4] ss:$8 sps:$4 sm:$0xff]  }
 0x13a   :  { %2784 = vmatpush1.bf16.msra.mxu0 %v5296_v10  ;;  %2029 = vmatprep.subr.bf16.mxu1 %v5301_v12  ;;  %v5371_v10 = vld [vmem:[#allocation6 + $0x7d0] ss:$8 sps:$4 sm:$0xff]  }
 0x13b   :  { %2785 = vmatprep.subr.bf16.mxu0 %v5304_v13  ;;  %2059 = vmatprep.mubr.bf16.mxu1 %v5866_v11  ;;  %v5374_v12 = vld [vmem:[#allocation6 + $0xad0] ss:$8 sps:$4 sm:$0xff]   ;;  %v5379_v13 = vld [vmem:[#allocation6 + $0x7e4] ss:$8 sps:$4 sm:$0xff]  }
 0x13c   :  { %2815 = vmatprep.mubr.bf16.mxu0 %v5866_v11  ;;  %v5320_v11 = vld [vmem:[#allocation6 + $0xa40] ss:$8 sps:$4 sm:$0xff]  }
 0x13d   :  { %2030 = vmatpush1.bf16.msra.mxu1 %v5299_v14  ;;  %v5382_v14 = vld [vmem:[#allocation6 + $0xae4] ss:$8 sps:$4 sm:$0xff]  }
 0x13e   :  { %2786 = vmatpush1.bf16.msra.mxu0 %v5302_v15  ;;  %2031 = vmatprep.subr.bf16.mxu1 %v5307_v16  ;;  %v5377_v15 = vld [vmem:[#allocation6 + $0x7e0] ss:$8 sps:$4 sm:$0xff]  }
 0x13f   :  { %2787 = vmatprep.subr.bf16.mxu0 %v5310_v17  ;;  %v5380_v16 = vld [vmem:[#allocation6 + $0xae0] ss:$8 sps:$4 sm:$0xff]   ;;  %v5385_v17 = vld [vmem:[#allocation6 + $0x7f4] ss:$8 sps:$4 sm:$0xff]  }
 0x141   :  { %2032 = vmatpush1.bf16.msra.mxu1 %v5305_v18  ;;  %v5388_v18 = vld [vmem:[#allocation6 + $0xaf4] ss:$8 sps:$4 sm:$0xff]  }
 0x142   :  { %2788 = vmatpush1.bf16.msra.mxu0 %v5308_v3  ;;  %2033 = vmatprep.subr.bf16.mxu1 %v5313_v19  ;;  %v5383_v3 = vld [vmem:[#allocation6 + $0x7f0] ss:$8 sps:$4 sm:$0xff]  }
 0x143   :  { %2789 = vmatprep.subr.bf16.mxu0 %v5316_v20  ;;  %v5386_v19 = vld [vmem:[#allocation6 + $0xaf0] ss:$8 sps:$4 sm:$0xff]   ;;  %v5391_v20 = vld [vmem:[#allocation6 + $0x904] ss:$8 sps:$4 sm:$0xff]  }
 0x145   :  { %2034 = vmatpush1.bf16.msra.mxu1 %v5311_v21  ;;  %v5394_v21 = vld [vmem:[#allocation6 + $0xc04] ss:$8 sps:$4 sm:$0xff]  }
 0x146   :  { %2790 = vmatpush1.bf16.msra.mxu0 %v5314_v22  ;;  %2035 = vmatprep.subr.bf16.mxu1 %v5319_v23  ;;  %v5389_v22 = vld [vmem:[#allocation6 + $0x900] ss:$8 sps:$4 sm:$0xff]  }
 0x147   :  { %2791 = vmatprep.subr.bf16.mxu0 %v5322_v48  ;;  %v5392_v23 = vld [vmem:[#allocation6 + $0xc00] ss:$8 sps:$4 sm:$0xff]   ;;  %v5397_v48 = vld [vmem:[#allocation6 + $0x914] ss:$8 sps:$4 sm:$0xff]  }
 0x149   :  { %2036 = vmatpush1.bf16.msra.mxu1 %v5317_v24  ;;  %v5400_v24 = vld [vmem:[#allocation6 + $0xc14] ss:$8 sps:$4 sm:$0xff]  }
 0x14a   :  { %2792 = vmatpush1.bf16.msra.mxu0 %v5320_v11  ;;  %2037 = vmatprep.subr.bf16.mxu1 %v5325_v25  ;;  %v5395_v11 = vld [vmem:[#allocation6 + $0x910] ss:$8 sps:$4 sm:$0xff]  }
 0x14b   :  { %2793 = vmatprep.subr.bf16.mxu0 %v5328_v26  ;;  %v5878_v31 = vpop.f32.mrb[0].mxu1  ;;  %v5398_v25 = vld [vmem:[#allocation6 + $0xc10] ss:$8 sps:$4 sm:$0xff]   ;;  %v5403_v26 = vld [vmem:[#allocation6 + $0x924] ss:$8 sps:$4 sm:$0xff]  }
 0x14c   :  { %v5880_v34 = vpop.f32.mrb[0].mxu0  ;;  %v5882_v35 = vpop.f32.mrb[1].mxu1 }
 0x14d   :  { %v5884_v36 = vpop.f32.mrb[1].mxu0  ;;  %v5886_v37 = vpop.f32.mrb[2].mxu1  ;;  %2038 = vmatpush1.bf16.msra.mxu1 %v5323_v27  ;;  %v5406_v27 = vld [vmem:[#allocation6 + $0xc24] ss:$8 sps:$4 sm:$0xff]  }
 0x14e   :  { %2794 = vmatpush1.bf16.msra.mxu0 %v5326_v28  ;;  %v5888_v38 = vpop.f32.mrb[2].mxu0  ;;  %v4831_v39 = vpack.c.bf16 %v5886_v37, %v5878_v31  ;;  %v5892_v40 = vpop.f32.mrb[3].mxu1  ;;  %2039 = vmatprep.subr.bf16.mxu1 %v5331_v29  ;;  %v5680_v28 = vld [vmem:[#allocation3 + $0x4] ss:$8 sps:$4 sm:$0xff]   ;;  %v5401_v29 = vld [vmem:[#allocation6 + $0x920] ss:$8 sps:$4 sm:$0xff]  }
 0x14f   :  { %2795 = vmatprep.subr.bf16.mxu0 %v5334_v30  ;;  %v4839_v43 = vpack.c.bf16 %v5888_v38, %v5880_v34  ;;  %v5896_v44 = vpop.f32.mrb[3].mxu0  ;;  %v4829_v45 = vpack.c.bf16 %v5892_v40, %v5882_v35  ;;  %v5404_v30 = vld [vmem:[#allocation6 + $0xc20] ss:$8 sps:$4 sm:$0xff]   ;;  %v5595_v31 = vld [vmem:[#allocation6 + $0xd34] ss:$8 sps:$4 sm:$0xff]  }
 0x150   :  { %v4837_v46 = vpack.c.bf16 %v5896_v44, %v5884_v36  ;;  %v5590_v35 = vld [vmem:[#allocation6 + $0xd20] ss:$8 sps:$4 sm:$0xff]   ;;  %v5593_v37 = vld [vmem:[#allocation6 + $0xd30] ss:$8 sps:$4 sm:$0xff]   ;;  %v5601_v34 = vld [vmem:[#allocation6 + $0xd54] ss:$8 sps:$4 sm:$0xff]  }
 0x151   :  { %2040 = vmatpush1.bf16.msra.mxu1 %v5329_v32  ;;  %v5409_v32 = vld [vmem:[#allocation6 + $0x934] ss:$8 sps:$4 sm:$0xff]   ;;  %v5596_v36 = vld [vmem:[#allocation6 + $0xd40] ss:$8 sps:$4 sm:$0xff]   ;;  %v5599_v38 = vld [vmem:[#allocation6 + $0xd50] ss:$8 sps:$4 sm:$0xff]  }
 0x152   :  { %2796 = vmatpush1.bf16.msra.mxu0 %v5332_v33  ;;  %2041 = vmatprep.subr.bf16.mxu1 %v5337_v41  ;;  %v5412_v33 = vld [vmem:[#allocation6 + $0xc34] ss:$8 sps:$4 sm:$0xff]   ;;  %v5407_v41 = vld [vmem:[#allocation6 + $0x930] ss:$8 sps:$4 sm:$0xff]   ;;  %v5604_v40 = vld [vmem:[#allocation6 + $0xd64] ss:$8 sps:$4 sm:$0xff]  }
 0x153   :  { %2797 = vmatprep.subr.bf16.mxu0 %v5340_v42  ;;  %v5410_v42 = vld [vmem:[#allocation6 + $0xc30] ss:$8 sps:$4 sm:$0xff]  }
 0x155   :  { %2042 = vmatpush1.bf16.msra.mxu1 %v5335_v47  ;;  %v5415_v47 = vld [vmem:[#allocation6 + $0x944] ss:$8 sps:$4 sm:$0xff]  }
 0x156   :  { %2798 = vmatpush1.bf16.msra.mxu0 %v5338_v49  ;;  %2043 = vmatprep.subr.bf16.mxu1 %v5343_v50  ;;  %v5418_v49 = vld [vmem:[#allocation6 + $0xc44] ss:$8 sps:$4 sm:$0xff]   ;;  %v5413_v50 = vld [vmem:[#allocation6 + $0x940] ss:$8 sps:$4 sm:$0xff]  }
 0x157   :  { %2799 = vmatprep.subr.bf16.mxu0 %v5346_v51  ;;  %v5416_v51 = vld [vmem:[#allocation6 + $0xc40] ss:$8 sps:$4 sm:$0xff]  }
 0x159   :  { %2044 = vmatpush1.bf16.msra.mxu1 %v5341_v52  ;;  %v5421_v52 = vld [vmem:[#allocation6 + $0x954] ss:$8 sps:$4 sm:$0xff]  }
 0x15a   :  { %2800 = vmatpush1.bf16.msra.mxu0 %v5344_v53  ;;  %2045 = vmatprep.subr.bf16.mxu1 %v5349_v54  ;;  %v5424_v53 = vld [vmem:[#allocation6 + $0xc54] ss:$8 sps:$4 sm:$0xff]   ;;  %v5419_v54 = vld [vmem:[#allocation6 + $0x950] ss:$8 sps:$4 sm:$0xff]  }
 0x15b   :  { %2801 = vmatprep.subr.bf16.mxu0 %v5352_v55  ;;  %v5422_v55 = vld [vmem:[#allocation6 + $0xc50] ss:$8 sps:$4 sm:$0xff]  }
 0x15d   :  { %2046 = vmatpush1.bf16.msra.mxu1 %v5347_v56  ;;  %v5427_v56 = vld [vmem:[#allocation6 + $0x964] ss:$8 sps:$4 sm:$0xff]  }
 0x15e   :  { %2802 = vmatpush1.bf16.msra.mxu0 %v5350_v57  ;;  %2047 = vmatprep.subr.bf16.mxu1 %v5355_v58  ;;  %v5430_v57 = vld [vmem:[#allocation6 + $0xc64] ss:$8 sps:$4 sm:$0xff]  }
 0x15f   :  { %2803 = vmatprep.subr.bf16.mxu0 %v5358_v59 }
 0x161   :  { %2048 = vmatpush1.bf16.msra.mxu1 %v5353_v60 }
 0x162   :  { %2804 = vmatpush1.bf16.msra.mxu0 %v5356_v61  ;;  %2049 = vmatprep.subr.bf16.mxu1 %v5361_v62 }
 0x163   :  { %2805 = vmatprep.subr.bf16.mxu0 %v5364_v63  ;;  %v5425_v63 = vld [vmem:[#allocation6 + $0x960] ss:$8 sps:$4 sm:$0xff]  }
 0x165   :  { %2050 = vmatpush1.bf16.msra.mxu1 %v5359_v0  ;;  %v5428_v0 = vld [vmem:[#allocation6 + $0xc60] ss:$8 sps:$4 sm:$0xff]  }
 0x166   :  { %2806 = vmatpush1.bf16.msra.mxu0 %v5362_v1  ;;  %2051 = vmatprep.subr.bf16.mxu1 %v5367_v2 }
 0x167   :  { %2807 = vmatprep.subr.bf16.mxu0 %v5370_v4 }
 0x169   :  { %2052 = vmatpush1.bf16.msra.mxu1 %v5365_v5  ;;  %v5433_v5 = vld [vmem:[#allocation6 + $0x974] ss:$8 sps:$4 sm:$0xff]  }
 0x16a   :  { %2808 = vmatpush1.bf16.msra.mxu0 %v5368_v6  ;;  %2053 = vmatprep.subr.bf16.mxu1 %v5373_v7  ;;  %v5436_v6 = vld [vmem:[#allocation6 + $0xc74] ss:$8 sps:$4 sm:$0xff]  }
 0x16b   :  { %2809 = vmatprep.subr.bf16.mxu0 %v5376_v9 }
 0x16d   :  { %2054 = vmatpush1.bf16.msra.mxu1 %v5371_v10 }
 0x16e   :  { %2810 = vmatpush1.bf16.msra.mxu0 %v5374_v12  ;;  %2055 = vmatprep.subr.bf16.mxu1 %v5379_v13  ;;  %v5431_v13 = vld [vmem:[#allocation6 + $0x970] ss:$8 sps:$4 sm:$0xff]  }
 0x16f   :  { %2811 = vmatprep.subr.bf16.mxu0 %v5382_v14  ;;  %v5434_v14 = vld [vmem:[#allocation6 + $0xc70] ss:$8 sps:$4 sm:$0xff]  }
 0x171   :  { %2056 = vmatpush1.bf16.msra.mxu1 %v5377_v15  ;;  %v5439_v15 = vld [vmem:[#allocation6 + $0x984] ss:$8 sps:$4 sm:$0xff]  }
 0x172   :  { %2812 = vmatpush1.bf16.msra.mxu0 %v5380_v16  ;;  %2057 = vmatprep.subr.bf16.mxu1 %v5385_v17  ;;  %v5442_v16 = vld [vmem:[#allocation6 + $0xc84] ss:$8 sps:$4 sm:$0xff]   ;;  %v5437_v17 = vld [vmem:[#allocation6 + $0x980] ss:$8 sps:$4 sm:$0xff]  }
 0x173   :  { %2813 = vmatprep.subr.bf16.mxu0 %v5388_v18  ;;  %v5440_v18 = vld [vmem:[#allocation6 + $0xc80] ss:$8 sps:$4 sm:$0xff]  }
 0x175   :  { %2058 = vmatpush1.bf16.msra.mxu1 %v5383_v3  ;;  %v5445_v3 = vld [vmem:[#allocation6 + $0x994] ss:$8 sps:$4 sm:$0xff]  }
 0x176   :  { %2814 = vmatpush1.bf16.msra.mxu0 %v5386_v19  ;;  %2531 = vmatprep.subr.bf16.mxu1 %v5391_v20  ;;  %v5448_v19 = vld [vmem:[#allocation6 + $0xc94] ss:$8 sps:$4 sm:$0xff]   ;;  %v5443_v20 = vld [vmem:[#allocation6 + $0x990] ss:$8 sps:$4 sm:$0xff]  }
 0x177   :  { %3287 = vmatprep.subr.bf16.mxu0 %v5394_v21  ;;  %v5446_v21 = vld [vmem:[#allocation6 + $0xc90] ss:$8 sps:$4 sm:$0xff]  }
 0x178   :  { %2060 = vmatmul.mubr.bf16.vlgmr.msra.gmra.mrb[16].mxu1 %v5872_v8 }
 0x179   :  { %2816 = vmatmul.mubr.bf16.vlgmr.msra.gmra.mrb[16].mxu0 %v5872_v8  ;;  %2532 = vmatpush1.bf16.msra.mxu1 %v5389_v22  ;;  %v5451_v22 = vld [vmem:[#allocation6 + $0x9a4] ss:$8 sps:$4 sm:$0xff]  }
 0x17a   :  { %3288 = vmatpush1.bf16.msra.mxu0 %v5392_v23  ;;  %2533 = vmatprep.subr.bf16.mxu1 %v5397_v48  ;;  %v5454_v23 = vld [vmem:[#allocation6 + $0xca4] ss:$8 sps:$4 sm:$0xff]   ;;  %v5449_v48 = vld [vmem:[#allocation6 + $0x9a0] ss:$8 sps:$4 sm:$0xff]  }
 0x17b   :  { %3289 = vmatprep.subr.bf16.mxu0 %v5400_v24  ;;  %2563 = vmatprep.mubr.bf16.mxu1 %v5680_v28  ;;  %v5452_v24 = vld [vmem:[#allocation6 + $0xca0] ss:$8 sps:$4 sm:$0xff]  }
 0x17c   :  { %3319 = vmatprep.mubr.bf16.mxu0 %v5680_v28  ;;  %v5463_v28 = vld [vmem:[#allocation6 + $0x9c4] ss:$8 sps:$4 sm:$0xff]  }
 0x17d   :  { %2534 = vmatpush1.bf16.msra.mxu1 %v5395_v11  ;;  %v5457_v11 = vld [vmem:[#allocation6 + $0x9b4] ss:$8 sps:$4 sm:$0xff]  }
 0x17e   :  { %3290 = vmatpush1.bf16.msra.mxu0 %v5398_v25  ;;  %2535 = vmatprep.subr.bf16.mxu1 %v5403_v26  ;;  %v5460_v25 = vld [vmem:[#allocation6 + $0xcb4] ss:$8 sps:$4 sm:$0xff]   ;;  %v5455_v26 = vld [vmem:[#allocation6 + $0x9b0] ss:$8 sps:$4 sm:$0xff]  }
 0x17f   :  { %3291 = vmatprep.subr.bf16.mxu0 %v5406_v27  ;;  %v5458_v27 = vld [vmem:[#allocation6 + $0xcb0] ss:$8 sps:$4 sm:$0xff]  }
 0x181   :  { %2536 = vmatpush1.bf16.msra.mxu1 %v5401_v29  ;;  %v5466_v29 = vld [vmem:[#allocation6 + $0xcc4] ss:$8 sps:$4 sm:$0xff]  }
 0x182   :  { %3292 = vmatpush1.bf16.msra.mxu0 %v5404_v30  ;;  %2537 = vmatprep.subr.bf16.mxu1 %v5409_v32  ;;  %v5461_v30 = vld [vmem:[#allocation6 + $0x9c0] ss:$8 sps:$4 sm:$0xff]  }
 0x183   :  { %3293 = vmatprep.subr.bf16.mxu0 %v5412_v33  ;;  %v5464_v32 = vld [vmem:[#allocation6 + $0xcc0] ss:$8 sps:$4 sm:$0xff]   ;;  %v5469_v33 = vld [vmem:[#allocation6 + $0x9d4] ss:$8 sps:$4 sm:$0xff]  }
 0x185   :  { %2538 = vmatpush1.bf16.msra.mxu1 %v5407_v41  ;;  %v5472_v41 = vld [vmem:[#allocation6 + $0xcd4] ss:$8 sps:$4 sm:$0xff]  }
 0x186   :  { %3294 = vmatpush1.bf16.msra.mxu0 %v5410_v42  ;;  %2539 = vmatprep.subr.bf16.mxu1 %v5415_v47  ;;  %v5467_v42 = vld [vmem:[#allocation6 + $0x9d0] ss:$8 sps:$4 sm:$0xff]  }
 0x187   :  { %3295 = vmatprep.subr.bf16.mxu0 %v5418_v49  ;;  %v5470_v47 = vld [vmem:[#allocation6 + $0xcd0] ss:$8 sps:$4 sm:$0xff]   ;;  %v5475_v49 = vld [vmem:[#allocation6 + $0x9e4] ss:$8 sps:$4 sm:$0xff]  }
 0x189   :  { %2540 = vmatpush1.bf16.msra.mxu1 %v5413_v50  ;;  %v5478_v50 = vld [vmem:[#allocation6 + $0xce4] ss:$8 sps:$4 sm:$0xff]  }
 0x18a   :  { %3296 = vmatpush1.bf16.msra.mxu0 %v5416_v51  ;;  %2541 = vmatprep.subr.bf16.mxu1 %v5421_v52  ;;  %v5473_v51 = vld [vmem:[#allocation6 + $0x9e0] ss:$8 sps:$4 sm:$0xff]  }
 0x18b   :  { %3297 = vmatprep.subr.bf16.mxu0 %v5424_v53  ;;  %v5904_v58 = vpop.f32.mrb[4].mxu1  ;;  %v5476_v52 = vld [vmem:[#allocation6 + $0xce0] ss:$8 sps:$4 sm:$0xff]   ;;  %v5481_v53 = vld [vmem:[#allocation6 + $0x9f4] ss:$8 sps:$4 sm:$0xff]  }
 0x18c   :  { %v5906_v59 = vpop.f32.mrb[4].mxu0  ;;  %v5908_v60 = vpop.f32.mrb[5].mxu1 }
 0x18d   :  { %v5910_v61 = vpop.f32.mrb[5].mxu0  ;;  %v5912_v62 = vpop.f32.mrb[6].mxu1  ;;  %2542 = vmatpush1.bf16.msra.mxu1 %v5419_v54  ;;  %v5484_v54 = vld [vmem:[#allocation6 + $0xcf4] ss:$8 sps:$4 sm:$0xff]  }
 0x18e   :  { %3298 = vmatpush1.bf16.msra.mxu0 %v5422_v55  ;;  %v5914_v1 = vpop.f32.mrb[6].mxu0  ;;  %v4835_v2 = vpack.c.bf16 %v5912_v62, %v5904_v58  ;;  %v5918_v4 = vpop.f32.mrb[7].mxu1  ;;  %2543 = vmatprep.subr.bf16.mxu1 %v5427_v56  ;;  %v5479_v55 = vld [vmem:[#allocation6 + $0x9f0] ss:$8 sps:$4 sm:$0xff]  }
 0x18f   :  { %3299 = vmatprep.subr.bf16.mxu0 %v5430_v57  ;;  %v4847_v7 = vpack.c.bf16 %v5914_v1, %v5906_v59  ;;  %v5922_v9 = vpop.f32.mrb[7].mxu0  ;;  %v4833_v10 = vpack.c.bf16 %v5918_v4, %v5908_v60  ;;  %v5482_v56 = vld [vmem:[#allocation6 + $0xcf0] ss:$8 sps:$4 sm:$0xff]   ;;  %v5487_v57 = vld [vmem:[#allocation6 + $0xb04] ss:$8 sps:$4 sm:$0xff]  }
 0x190   :  { %v4845_v12 = vpack.c.bf16 %v5922_v9, %v5910_v61  ;;  %v5602_v60 = vld [vmem:[#allocation6 + $0xd60] ss:$8 sps:$4 sm:$0xff]   ;;  %v5607_v4 = vld [vmem:[#allocation6 + $0xd74] ss:$8 sps:$4 sm:$0xff]  }
 0x191   :  { %2544 = vmatpush1.bf16.msra.mxu1 %v5425_v63  ;;  %v5490_v63 = vld [vmem:[#allocation6 + $0xe04] ss:$8 sps:$4 sm:$0xff]  }
 0x192   :  { %3300 = vmatpush1.bf16.msra.mxu0 %v5428_v0  ;;  %2545 = vmatprep.subr.bf16.mxu1 %v5433_v5  ;;  %v5485_v0 = vld [vmem:[#allocation6 + $0xb00] ss:$8 sps:$4 sm:$0xff]  }
 0x193   :  { %3301 = vmatprep.subr.bf16.mxu0 %v5436_v6  ;;  %v5488_v5 = vld [vmem:[#allocation6 + $0xe00] ss:$8 sps:$4 sm:$0xff]   ;;  %v5493_v6 = vld [vmem:[#allocation6 + $0xb14] ss:$8 sps:$4 sm:$0xff]  }
 0x195   :  { %2546 = vmatpush1.bf16.msra.mxu1 %v5431_v13  ;;  %v5496_v13 = vld [vmem:[#allocation6 + $0xe14] ss:$8 sps:$4 sm:$0xff]  }
 0x196   :  { %3302 = vmatpush1.bf16.msra.mxu0 %v5434_v14  ;;  %2547 = vmatprep.subr.bf16.mxu1 %v5439_v15  ;;  %v5928_v14 = vld [vmem:[#allocation3 + $0x4] ss:$8 sps:$4 sm:$0xff]   ;;  %v5491_v15 = vld [vmem:[#allocation6 + $0xb10] ss:$8 sps:$4 sm:$0xff]  }
 0x197   :  { %3303 = vmatprep.subr.bf16.mxu0 %v5442_v16  ;;  %v5494_v16 = vld [vmem:[#allocation6 + $0xe10] ss:$8 sps:$4 sm:$0xff]  }
 0x199   :  { %2548 = vmatpush1.bf16.msra.mxu1 %v5437_v17  ;;  %v5499_v17 = vld [vmem:[#allocation6 + $0xb24] ss:$8 sps:$4 sm:$0xff]  }
 0x19a   :  { %3304 = vmatpush1.bf16.msra.mxu0 %v5440_v18  ;;  %2549 = vmatprep.subr.bf16.mxu1 %v5445_v3  ;;  %v5502_v18 = vld [vmem:[#allocation6 + $0xe24] ss:$8 sps:$4 sm:$0xff]   ;;  %v5497_v3 = vld [vmem:[#allocation6 + $0xb20] ss:$8 sps:$4 sm:$0xff]  }
 0x19b   :  { %3305 = vmatprep.subr.bf16.mxu0 %v5448_v19  ;;  %v5500_v19 = vld [vmem:[#allocation6 + $0xe20] ss:$8 sps:$4 sm:$0xff]  }
 0x19d   :  { %2550 = vmatpush1.bf16.msra.mxu1 %v5443_v20  ;;  %v5505_v20 = vld [vmem:[#allocation6 + $0xb34] ss:$8 sps:$4 sm:$0xff]  }
 0x19e   :  { %3306 = vmatpush1.bf16.msra.mxu0 %v5446_v21  ;;  %2551 = vmatprep.subr.bf16.mxu1 %v5451_v22  ;;  %v5503_v21 = vld [vmem:[#allocation6 + $0xb30] ss:$8 sps:$4 sm:$0xff]  }
 0x19f   :  { %3307 = vmatprep.subr.bf16.mxu0 %v5454_v23  ;;  %v5506_v22 = vld [vmem:[#allocation6 + $0xe30] ss:$8 sps:$4 sm:$0xff]   ;;  %v5511_v23 = vld [vmem:[#allocation6 + $0xb44] ss:$8 sps:$4 sm:$0xff]  }
 0x1a1   :  { %2552 = vmatpush1.bf16.msra.mxu1 %v5449_v48  ;;  %v5514_v48 = vld [vmem:[#allocation6 + $0xe44] ss:$8 sps:$4 sm:$0xff]  }
 0x1a2   :  { %3308 = vmatpush1.bf16.msra.mxu0 %v5452_v24  ;;  %2553 = vmatprep.subr.bf16.mxu1 %v5457_v11  ;;  %v5509_v24 = vld [vmem:[#allocation6 + $0xb40] ss:$8 sps:$4 sm:$0xff]  }
 0x1a3   :  { %3309 = vmatprep.subr.bf16.mxu0 %v5460_v25  ;;  %v5512_v11 = vld [vmem:[#allocation6 + $0xe40] ss:$8 sps:$4 sm:$0xff]   ;;  %v5517_v25 = vld [vmem:[#allocation6 + $0xb54] ss:$8 sps:$4 sm:$0xff]  }
 0x1a5   :  { %2554 = vmatpush1.bf16.msra.mxu1 %v5455_v26  ;;  %v5520_v26 = vld [vmem:[#allocation6 + $0xe54] ss:$8 sps:$4 sm:$0xff]  }
 0x1a6   :  { %3310 = vmatpush1.bf16.msra.mxu0 %v5458_v27  ;;  %2555 = vmatprep.subr.bf16.mxu1 %v5463_v28  ;;  %v5515_v27 = vld [vmem:[#allocation6 + $0xb50] ss:$8 sps:$4 sm:$0xff]  }
 0x1a7   :  { %3311 = vmatprep.subr.bf16.mxu0 %v5466_v29  ;;  %v5518_v28 = vld [vmem:[#allocation6 + $0xe50] ss:$8 sps:$4 sm:$0xff]   ;;  %v5523_v29 = vld [vmem:[#allocation6 + $0xb64] ss:$8 sps:$4 sm:$0xff]  }
 0x1a9   :  { %2556 = vmatpush1.bf16.msra.mxu1 %v5461_v30  ;;  %v5526_v30 = vld [vmem:[#allocation6 + $0xe64] ss:$8 sps:$4 sm:$0xff]  }
 0x1aa   :  { %3312 = vmatpush1.bf16.msra.mxu0 %v5464_v32  ;;  %2557 = vmatprep.subr.bf16.mxu1 %v5469_v33 }
 0x1ab   :  { %3313 = vmatprep.subr.bf16.mxu0 %v5472_v41 }
 0x1ad   :  { %2558 = vmatpush1.bf16.msra.mxu1 %v5467_v42 }
 0x1ae   :  { %3314 = vmatpush1.bf16.msra.mxu0 %v5470_v47  ;;  %2559 = vmatprep.subr.bf16.mxu1 %v5475_v49  ;;  %v5521_v49 = vld [vmem:[#allocation6 + $0xb60] ss:$8 sps:$4 sm:$0xff]  }
 0x1af   :  { %3315 = vmatprep.subr.bf16.mxu0 %v5478_v50  ;;  %v5524_v50 = vld [vmem:[#allocation6 + $0xe60] ss:$8 sps:$4 sm:$0xff]  }
 0x1b1   :  { %2560 = vmatpush1.bf16.msra.mxu1 %v5473_v51 }
 0x1b2   :  { %3316 = vmatpush1.bf16.msra.mxu0 %v5476_v52  ;;  %2561 = vmatprep.subr.bf16.mxu1 %v5481_v53 }
 0x1b3   :  { %3317 = vmatprep.subr.bf16.mxu0 %v5484_v54  ;;  %v5529_v54 = vld [vmem:[#allocation6 + $0xb74] ss:$8 sps:$4 sm:$0xff]  }
 0x1b5   :  { %2562 = vmatpush1.bf16.msra.mxu1 %v5479_v55  ;;  %v5532_v55 = vld [vmem:[#allocation6 + $0xe74] ss:$8 sps:$4 sm:$0xff]  }
 0x1b6   :  { %3318 = vmatpush1.bf16.msra.mxu0 %v5482_v56  ;;  %3035 = vmatprep.subr.bf16.mxu1 %v5487_v57 }
 0x1b7   :  { %3791 = vmatprep.subr.bf16.mxu0 %v5490_v63 }
 0x1b8   :  { %2564 = vmatmul.mubr.bf16.vlgmr.msra.gmra.mrb[20].mxu1 %v5872_v8 }
 0x1b9   :  { %3320 = vmatmul.mubr.bf16.vlgmr.msra.gmra.mrb[20].mxu0 %v5872_v8  ;;  %3036 = vmatpush1.bf16.msra.mxu1 %v5485_v0  ;;  %v5508_v8 = vld [vmem:[#allocation6 + $0xe34] ss:$8 sps:$4 sm:$0xff]  }
 0x1ba   :  { %3792 = vmatpush1.bf16.msra.mxu0 %v5488_v5  ;;  %3037 = vmatprep.subr.bf16.mxu1 %v5493_v6  ;;  %v5527_v5 = vld [vmem:[#allocation6 + $0xb70] ss:$8 sps:$4 sm:$0xff]  }
 0x1bb   :  { %3793 = vmatprep.subr.bf16.mxu0 %v5496_v13  ;;  %3067 = vmatprep.mubr.bf16.mxu1 %v5928_v14  ;;  %v5530_v6 = vld [vmem:[#allocation6 + $0xe70] ss:$8 sps:$4 sm:$0xff]   ;;  %v5535_v13 = vld [vmem:[#allocation6 + $0xb84] ss:$8 sps:$4 sm:$0xff]  }
 0x1bc   :  { %3823 = vmatprep.mubr.bf16.mxu0 %v5928_v14 }
 0x1bd   :  { %3038 = vmatpush1.bf16.msra.mxu1 %v5491_v15  ;;  %v5538_v15 = vld [vmem:[#allocation6 + $0xe84] ss:$8 sps:$4 sm:$0xff]  }
 0x1be   :  { %3794 = vmatpush1.bf16.msra.mxu0 %v5494_v16  ;;  %3039 = vmatprep.subr.bf16.mxu1 %v5499_v17  ;;  %v5533_v16 = vld [vmem:[#allocation6 + $0xb80] ss:$8 sps:$4 sm:$0xff]  }
 0x1bf   :  { %3795 = vmatprep.subr.bf16.mxu0 %v5502_v18  ;;  %v5536_v17 = vld [vmem:[#allocation6 + $0xe80] ss:$8 sps:$4 sm:$0xff]   ;;  %v5541_v18 = vld [vmem:[#allocation6 + $0xb94] ss:$8 sps:$4 sm:$0xff]  }
 0x1c1   :  { %3040 = vmatpush1.bf16.msra.mxu1 %v5497_v3  ;;  %v5544_v3 = vld [vmem:[#allocation6 + $0xe94] ss:$8 sps:$4 sm:$0xff]  }
 0x1c2   :  { %3796 = vmatpush1.bf16.msra.mxu0 %v5500_v19  ;;  %3041 = vmatprep.subr.bf16.mxu1 %v5505_v20  ;;  %v5539_v19 = vld [vmem:[#allocation6 + $0xb90] ss:$8 sps:$4 sm:$0xff]  }
 0x1c3   :  { %3797 = vmatprep.subr.bf16.mxu0 %v5508_v8  ;;  %v5542_v20 = vld [vmem:[#allocation6 + $0xe90] ss:$8 sps:$4 sm:$0xff]   ;;  %v5547_v8 = vld [vmem:[#allocation6 + $0xba4] ss:$8 sps:$4 sm:$0xff]  }
 0x1c5   :  { %3042 = vmatpush1.bf16.msra.mxu1 %v5503_v21  ;;  %v5550_v21 = vld [vmem:[#allocation6 + $0xea4] ss:$8 sps:$4 sm:$0xff]  }
 0x1c6   :  { %3798 = vmatpush1.bf16.msra.mxu0 %v5506_v22  ;;  %3043 = vmatprep.subr.bf16.mxu1 %v5511_v23  ;;  %v5545_v22 = vld [vmem:[#allocation6 + $0xba0] ss:$8 sps:$4 sm:$0xff]  }
 0x1c7   :  { %3799 = vmatprep.subr.bf16.mxu0 %v5514_v48  ;;  %v5548_v23 = vld [vmem:[#allocation6 + $0xea0] ss:$8 sps:$4 sm:$0xff]   ;;  %v5553_v48 = vld [vmem:[#allocation6 + $0xbb4] ss:$8 sps:$4 sm:$0xff]  }
 0x1c9   :  { %3044 = vmatpush1.bf16.msra.mxu1 %v5509_v24  ;;  %v5556_v24 = vld [vmem:[#allocation6 + $0xeb4] ss:$8 sps:$4 sm:$0xff]  }
 0x1ca   :  { %3800 = vmatpush1.bf16.msra.mxu0 %v5512_v11  ;;  %3045 = vmatprep.subr.bf16.mxu1 %v5517_v25  ;;  %v5551_v11 = vld [vmem:[#allocation6 + $0xbb0] ss:$8 sps:$4 sm:$0xff]  }
 0x1cb   :  { %3801 = vmatprep.subr.bf16.mxu0 %v5520_v26  ;;  %v5934_v32 = vpop.f32.mrb[8].mxu1  ;;  %v5554_v25 = vld [vmem:[#allocation6 + $0xeb0] ss:$8 sps:$4 sm:$0xff]   ;;  %v5559_v26 = vld [vmem:[#allocation6 + $0xbc4] ss:$8 sps:$4 sm:$0xff]  }
 0x1cc   :  { %v5936_v33 = vpop.f32.mrb[8].mxu0  ;;  %v5938_v41 = vpop.f32.mrb[9].mxu1 }
 0x1cd   :  { %v5940_v42 = vpop.f32.mrb[9].mxu0  ;;  %v5942_v47 = vpop.f32.mrb[10].mxu1  ;;  %3046 = vmatpush1.bf16.msra.mxu1 %v5515_v27  ;;  %v5562_v27 = vld [vmem:[#allocation6 + $0xec4] ss:$8 sps:$4 sm:$0xff]  }
 0x1ce   :  { %3802 = vmatpush1.bf16.msra.mxu0 %v5518_v28  ;;  %v5944_v51 = vpop.f32.mrb[10].mxu0  ;;  %v4843_v52 = vpack.c.bf16 %v5942_v47, %v5934_v32  ;;  %v5948_v53 = vpop.f32.mrb[11].mxu1  ;;  %3047 = vmatprep.subr.bf16.mxu1 %v5523_v29  ;;  %v5557_v28 = vld [vmem:[#allocation6 + $0xbc0] ss:$8 sps:$4 sm:$0xff]   ;;  %v5611_v47 = vld [vmem:[#allocation6 + $0xd90] ss:$8 sps:$4 sm:$0xff]  }
 0x1cf   :  { %3803 = vmatprep.subr.bf16.mxu0 %v5526_v30  ;;  %v4855_v56 = vpack.c.bf16 %v5944_v51, %v5936_v33  ;;  %v5952_v57 = vpop.f32.mrb[11].mxu0  ;;  %v4841_v63 = vpack.c.bf16 %v5948_v53, %v5938_v41  ;;  %v5560_v29 = vld [vmem:[#allocation6 + $0xec0] ss:$8 sps:$4 sm:$0xff]   ;;  %v5565_v30 = vld [vmem:[#allocation6 + $0xbd4] ss:$8 sps:$4 sm:$0xff]  }
 0x1d0   :  { %v4853_v0 = vpack.c.bf16 %v5952_v57, %v5940_v42  ;;  %v5608_v32 = vld [vmem:[#allocation6 + $0xd80] ss:$8 sps:$4 sm:$0xff]   ;;  %v5613_v41 = vld [vmem:[#allocation6 + $0xd94] ss:$8 sps:$4 sm:$0xff]   ;;  %v5622_v42 = vld [vmem:[#allocation6 + $0xdc4] ss:$8 sps:$4 sm:$0xff]  }
 0x1d1   :  { %3048 = vmatpush1.bf16.msra.mxu1 %v5521_v49  ;;  %v5568_v49 = vld [vmem:[#allocation6 + $0xed4] ss:$8 sps:$4 sm:$0xff]   ;;  %v5614_v53 = vld [vmem:[#allocation6 + $0xda0] ss:$8 sps:$4 sm:$0xff]   ;;  %v5628_v33 = vld [vmem:[#allocation6 + $0xde4] ss:$8 sps:$4 sm:$0xff]  }
 0x1d2   :  { %3804 = vmatpush1.bf16.msra.mxu0 %v5524_v50  ;;  %3049 = vmatprep.subr.bf16.mxu1 %v5529_v54  ;;  %v5563_v50 = vld [vmem:[#allocation6 + $0xbd0] ss:$8 sps:$4 sm:$0xff]   ;;  %v5620_v57 = vld [vmem:[#allocation6 + $0xdc0] ss:$8 sps:$4 sm:$0xff]  }
 0x1d3   :  { %3805 = vmatprep.subr.bf16.mxu0 %v5532_v55  ;;  %v5566_v54 = vld [vmem:[#allocation6 + $0xed0] ss:$8 sps:$4 sm:$0xff]   ;;  %v5571_v55 = vld [vmem:[#allocation6 + $0xbe4] ss:$8 sps:$4 sm:$0xff]   ;;  %v5626_v51 = vld [vmem:[#allocation6 + $0xde0] ss:$8 sps:$4 sm:$0xff]  }
 0x1d5   :  { %3050 = vmatpush1.bf16.msra.mxu1 %v5527_v5  ;;  %v5574_v5 = vld [vmem:[#allocation6 + $0xee4] ss:$8 sps:$4 sm:$0xff]  }
 0x1d6   :  { %3806 = vmatpush1.bf16.msra.mxu0 %v5530_v6  ;;  %3051 = vmatprep.subr.bf16.mxu1 %v5535_v13  ;;  %v5569_v6 = vld [vmem:[#allocation6 + $0xbe0] ss:$8 sps:$4 sm:$0xff]  }
 0x1d7   :  { %3807 = vmatprep.subr.bf16.mxu0 %v5538_v15  ;;  %v5572_v13 = vld [vmem:[#allocation6 + $0xee0] ss:$8 sps:$4 sm:$0xff]   ;;  %v5577_v15 = vld [vmem:[#allocation6 + $0xbf4] ss:$8 sps:$4 sm:$0xff]  }
 0x1d9   :  { %3052 = vmatpush1.bf16.msra.mxu1 %v5533_v16  ;;  %v5580_v16 = vld [vmem:[#allocation6 + $0xef4] ss:$8 sps:$4 sm:$0xff]  }
 0x1da   :  { %3808 = vmatpush1.bf16.msra.mxu0 %v5536_v17  ;;  %3053 = vmatprep.subr.bf16.mxu1 %v5541_v18  ;;  %v5575_v17 = vld [vmem:[#allocation6 + $0xbf0] ss:$8 sps:$4 sm:$0xff]  }
 0x1db   :  { %3809 = vmatprep.subr.bf16.mxu0 %v5544_v3  ;;  %v5578_v18 = vld [vmem:[#allocation6 + $0xef0] ss:$8 sps:$4 sm:$0xff]   ;;  %v5586_v3 = vld [vmem:[#allocation6 + $0xd04] ss:$8 sps:$4 sm:$0xff]  }
 0x1dd   :  { %3054 = vmatpush1.bf16.msra.mxu1 %v5539_v19  ;;  %v5958_v19 = vld [vmem:[#allocation3] ss:$8 sps:$4 sm:$0xff]  }
 0x1de   :  { %3810 = vmatpush1.bf16.msra.mxu0 %v5542_v20  ;;  %3055 = vmatprep.subr.bf16.mxu1 %v5547_v8  ;;  %v5584_v20 = vld [vmem:[#allocation6 + $0xd00] ss:$8 sps:$4 sm:$0xff]   ;;  %v5589_v8 = vld [vmem:[#allocation6 + $0xd14] ss:$8 sps:$4 sm:$0xff]  }
 0x1df   :  { %3811 = vmatprep.subr.bf16.mxu0 %v5550_v21  ;;  %v5587_v21 = vld [vmem:[#allocation6 + $0xd10] ss:$8 sps:$4 sm:$0xff]  }
 0x1e1   :  { %3056 = vmatpush1.bf16.msra.mxu1 %v5545_v22  ;;  %v5592_v22 = vld [vmem:[#allocation6 + $0xd24] ss:$8 sps:$4 sm:$0xff]  }
 0x1e2   :  { %3812 = vmatpush1.bf16.msra.mxu0 %v5548_v23  ;;  %3057 = vmatprep.subr.bf16.mxu1 %v5553_v48  ;;  %v5617_v23 = vld [vmem:[#allocation6 + $0xdb0] ss:$8 sps:$4 sm:$0xff]  }
 0x1e3   :  { %3813 = vmatprep.subr.bf16.mxu0 %v5556_v24  ;;  %v5623_v48 = vld [vmem:[#allocation6 + $0xdd0] ss:$8 sps:$4 sm:$0xff]  }
 0x1e4   :  { %v5629_v24 = vld [vmem:[#allocation6 + $0xdf0] ss:$8 sps:$4 sm:$0xff]  }
 0x1e5   :  { %3058 = vmatpush1.bf16.msra.mxu1 %v5551_v11  ;;  %v5634_v11 = vld [vmem:[#allocation6 + $0xf04] ss:$8 sps:$4 sm:$0xff]  }
 0x1e6   :  { %3814 = vmatpush1.bf16.msra.mxu0 %v5554_v25  ;;  %3059 = vmatprep.subr.bf16.mxu1 %v5559_v26  ;;  %v5632_v25 = vld [vmem:[#allocation6 + $0xf00] ss:$8 sps:$4 sm:$0xff]   ;;  %v5637_v26 = vld [vmem:[#allocation6 + $0xf14] ss:$8 sps:$4 sm:$0xff]  }
 0x1e7   :  { %3815 = vmatprep.subr.bf16.mxu0 %v5562_v27  ;;  %v5635_v27 = vld [vmem:[#allocation6 + $0xf10] ss:$8 sps:$4 sm:$0xff]  }
 0x1e9   :  { %3060 = vmatpush1.bf16.msra.mxu1 %v5557_v28  ;;  %v5640_v28 = vld [vmem:[#allocation6 + $0xf24] ss:$8 sps:$4 sm:$0xff]  }
 0x1ea   :  { %3816 = vmatpush1.bf16.msra.mxu0 %v5560_v29  ;;  %3061 = vmatprep.subr.bf16.mxu1 %v5565_v30  ;;  %v5638_v29 = vld [vmem:[#allocation6 + $0xf20] ss:$8 sps:$4 sm:$0xff]   ;;  %v5643_v30 = vld [vmem:[#allocation6 + $0xf34] ss:$8 sps:$4 sm:$0xff]  }
 0x1eb   :  { %3817 = vmatprep.subr.bf16.mxu0 %v5568_v49  ;;  %v5641_v49 = vld [vmem:[#allocation6 + $0xf30] ss:$8 sps:$4 sm:$0xff]  }
 0x1ed   :  { %3062 = vmatpush1.bf16.msra.mxu1 %v5563_v50  ;;  %v5646_v50 = vld [vmem:[#allocation6 + $0xf44] ss:$8 sps:$4 sm:$0xff]  }
 0x1ee   :  { %3818 = vmatpush1.bf16.msra.mxu0 %v5566_v54  ;;  %3063 = vmatprep.subr.bf16.mxu1 %v5571_v55  ;;  %v5644_v54 = vld [vmem:[#allocation6 + $0xf40] ss:$8 sps:$4 sm:$0xff]   ;;  %v5649_v55 = vld [vmem:[#allocation6 + $0xf54] ss:$8 sps:$4 sm:$0xff]  }
 0x1ef   :  { %3819 = vmatprep.subr.bf16.mxu0 %v5574_v5  ;;  %v5647_v5 = vld [vmem:[#allocation6 + $0xf50] ss:$8 sps:$4 sm:$0xff]  }
 0x1f1   :  { %3064 = vmatpush1.bf16.msra.mxu1 %v5569_v6  ;;  %v5652_v6 = vld [vmem:[#allocation6 + $0xf64] ss:$8 sps:$4 sm:$0xff]  }
 0x1f2   :  { %3820 = vmatpush1.bf16.msra.mxu0 %v5572_v13  ;;  %3065 = vmatprep.subr.bf16.mxu1 %v5577_v15 }
 0x1f3   :  { %3821 = vmatprep.subr.bf16.mxu0 %v5580_v16 }
 0x1f5   :  { %3066 = vmatpush1.bf16.msra.mxu1 %v5575_v17 }
 0x1f6   :  { %3822 = vmatpush1.bf16.msra.mxu0 %v5578_v18  ;;  %3539 = vmatprep.subr.bf16.mxu1 %v5586_v3  ;;  %v5650_v18 = vld [vmem:[#allocation6 + $0xf60] ss:$8 sps:$4 sm:$0xff]  }
 0x1f7   :  { %4830 = vmatprep.subr.bf16.mxu0 %v4829_v45 }
 0x1f8   :  { %3068 = vmatmul.mubr.bf16.vlgmr.msra.gmra.mrb[24].mxu1 %v5958_v19 }
 0x1f9   :  { %3824 = vmatmul.mubr.bf16.vlgmr.msra.gmra.mrb[24].mxu0 %v5958_v19  ;;  %3540 = vmatpush1.bf16.msra.mxu1 %v5584_v20 }
 0x1fa   :  { %4832 = vmatpush1.bf16.msra.mxu0 %v4831_v39  ;;  %3541 = vmatprep.subr.bf16.mxu1 %v5589_v8  ;;  %v5598_v39 = vld [vmem:[#allocation6 + $0xd44] ss:$8 sps:$4 sm:$0xff]  }
 0x1fb   :  { %4834 = vmatprep.subr.bf16.mxu0 %v4833_v10  ;;  %3571 = vmatprep.mubr.bf16.mxu1 %v5928_v14  ;;  %v5605_v10 = vld [vmem:[#allocation6 + $0xd70] ss:$8 sps:$4 sm:$0xff]  }
 0x1fd   :  { %3542 = vmatpush1.bf16.msra.mxu1 %v5587_v21  ;;  %v5655_v21 = vld [vmem:[#allocation6 + $0xf74] ss:$8 sps:$4 sm:$0xff]  }
 0x1fe   :  { %4836 = vmatpush1.bf16.msra.mxu0 %v4835_v2  ;;  %3543 = vmatprep.subr.bf16.mxu1 %v5592_v22 }
 0x1ff   :  { %4838 = vmatprep.subr.bf16.mxu0 %v4837_v46 }
 0x201   :  { %3544 = vmatpush1.bf16.msra.mxu1 %v5590_v35 }
 0x202   :  { %4840 = vmatpush1.bf16.msra.mxu0 %v4839_v43  ;;  %3545 = vmatprep.subr.bf16.mxu1 %v5595_v31 }
 0x203   :  { %4842 = vmatprep.subr.bf16.mxu0 %v4841_v63  ;;  %v5619_v63 = vld [vmem:[#allocation6 + $0xdb4] ss:$8 sps:$4 sm:$0xff]  }
 0x205   :  { %3546 = vmatpush1.bf16.msra.mxu1 %v5593_v37 }
 0x206   :  { %4844 = vmatpush1.bf16.msra.mxu0 %v4843_v52  ;;  %3547 = vmatprep.subr.bf16.mxu1 %v5598_v39  ;;  %v5616_v52 = vld [vmem:[#allocation6 + $0xda4] ss:$8 sps:$4 sm:$0xff]   ;;  %v5653_v39 = vld [vmem:[#allocation6 + $0xf70] ss:$8 sps:$4 sm:$0xff]  }
 0x207   :  { %4846 = vmatprep.subr.bf16.mxu0 %v4845_v12  ;;  %v5610_v12 = vld [vmem:[#allocation6 + $0xd84] ss:$8 sps:$4 sm:$0xff]  }
 0x209   :  { %3548 = vmatpush1.bf16.msra.mxu1 %v5596_v36  ;;  %v5658_v36 = vld [vmem:[#allocation6 + $0xf84] ss:$8 sps:$4 sm:$0xff]  }
 0x20a   :  { %4848 = vmatpush1.bf16.msra.mxu0 %v4847_v7  ;;  %3549 = vmatprep.subr.bf16.mxu1 %v5601_v34  ;;  %v5656_v34 = vld [vmem:[#allocation6 + $0xf80] ss:$8 sps:$4 sm:$0xff]  }
 0x20b   :  { %v1557_v43 = vpop.f32.mrb[12].mxu1 }
 0x20c   :  { %v5993_v44 = vpop.f32.mrb[12].mxu0  ;;  %v1559_v45 = vpop.f32.mrb[13].mxu1 }
 0x20d   :  { %v5995_v46 = vpop.f32.mrb[13].mxu0  ;;  %v1561_v58 = vpop.f32.mrb[14].mxu1  ;;  %3550 = vmatpush1.bf16.msra.mxu1 %v5599_v38  ;;  %v5661_v38 = vld [vmem:[#allocation6 + $0xf94] ss:$8 sps:$4 sm:$0xff]  }
 0x20e   :  { %v5997_v61 = vpop.f32.mrb[14].mxu0  ;;  %v4851_v62 = vpack.c.bf16 %v1561_v58, %v1557_v43  ;;  %v1563_v2 = vpop.f32.mrb[15].mxu1  ;;  %3551 = vmatprep.subr.bf16.mxu1 %v5604_v40  ;;  %v5659_v40 = vld [vmem:[#allocation6 + $0xf90] ss:$8 sps:$4 sm:$0xff]   ;;  %v5664_v43 = vld [vmem:[#allocation6 + $0xfa4] ss:$8 sps:$4 sm:$0xff]  }
 0x20f   :  { %v4863_v59 = vpack.c.bf16 %v5997_v61, %v5993_v44  ;;  %v6001_v1 = vpop.f32.mrb[15].mxu0  ;;  %v4849_v7 = vpack.c.bf16 %v1563_v2, %v1559_v45  ;;  %v5662_v45 = vld [vmem:[#allocation6 + $0xfa0] ss:$8 sps:$4 sm:$0xff]   ;;  %v5667_v58 = vld [vmem:[#allocation6 + $0xfb4] ss:$8 sps:$4 sm:$0xff]  }
 0x210   :  { %v4861_v9 = vpack.c.bf16 %v6001_v1, %v5995_v46  ;;  %v5670_v46 = vld [vmem:[#allocation6 + $0xfc4] ss:$8 sps:$4 sm:$0xff]   ;;  %v5673_v2 = vld [vmem:[#allocation6 + $0xfd4] ss:$8 sps:$4 sm:$0xff]   ;;  %v5674_v61 = vld [vmem:[#allocation6 + $0xfe0] ss:$8 sps:$4 sm:$0xff]  }
 0x211   :  { %3552 = vmatpush1.bf16.msra.mxu1 %v5602_v60  ;;  %4850 = vmatprep.subr.bf16.mxu0 %v4849_v7  ;;  %v5665_v60 = vld [vmem:[#allocation6 + $0xfb0] ss:$8 sps:$4 sm:$0xff]   ;;  %v5676_v44 = vld [vmem:[#allocation6 + $0xfe4] ss:$8 sps:$4 sm:$0xff]  }
 0x212   :  { %4852 = vmatpush1.bf16.msra.mxu0 %v4851_v62  ;;  %3553 = vmatprep.subr.bf16.mxu1 %v5607_v4  ;;  %v5668_v62 = vld [vmem:[#allocation6 + $0xfc0] ss:$8 sps:$4 sm:$0xff]   ;;  %v5671_v4 = vld [vmem:[#allocation6 + $0xfd0] ss:$8 sps:$4 sm:$0xff]  }
 0x213   :  { %4854 = vmatprep.subr.bf16.mxu0 %v4853_v0  ;;  %v5625_v0 = vld [vmem:[#allocation6 + $0xdd4] ss:$8 sps:$4 sm:$0xff]   ;;  %v5677_v1 = vld [vmem:[#allocation6 + $0xff0] ss:$8 sps:$4 sm:$0xff]  }
 0x215   :  { %3554 = vmatpush1.bf16.msra.mxu1 %v5605_v10 }
 0x216   :  { %3555 = vmatprep.subr.bf16.mxu1 %v5610_v12  ;;  %4856 = vmatpush1.bf16.msra.mxu0 %v4855_v56  ;;  %v5631_v56 = vld [vmem:[#allocation6 + $0xdf4] ss:$8 sps:$4 sm:$0xff]  }
 0x219   :  { %3556 = vmatpush1.bf16.msra.mxu1 %v5608_v32 }
 0x21a   :  { %3557 = vmatprep.subr.bf16.mxu1 %v5613_v41 }
 0x21d   :  { %3558 = vmatpush1.bf16.msra.mxu1 %v5611_v47 }
 0x21e   :  { %3559 = vmatprep.subr.bf16.mxu1 %v5616_v52 }
 0x221   :  { %3560 = vmatpush1.bf16.msra.mxu1 %v5614_v53 }
 0x222   :  { %3561 = vmatprep.subr.bf16.mxu1 %v5619_v63 }
 0x225   :  { %3562 = vmatpush1.bf16.msra.mxu1 %v5617_v23 }
 0x226   :  { %3563 = vmatprep.subr.bf16.mxu1 %v5622_v42 }
 0x229   :  { %3564 = vmatpush1.bf16.msra.mxu1 %v5620_v57 }
 0x22a   :  { %3565 = vmatprep.subr.bf16.mxu1 %v5625_v0 }
 0x22d   :  { %3566 = vmatpush1.bf16.msra.mxu1 %v5623_v48 }
 0x22e   :  { %3567 = vmatprep.subr.bf16.mxu1 %v5628_v33 }
 0x231   :  { %3568 = vmatpush1.bf16.msra.mxu1 %v5626_v51 }
 0x232   :  { %3569 = vmatprep.subr.bf16.mxu1 %v5631_v56 }
 0x235   :  { %3570 = vmatpush1.bf16.msra.mxu1 %v5629_v24 }
 0x236   :  { %4043 = vmatprep.subr.bf16.mxu1 %v5634_v11 }
 0x238   :  { %3572 = vmatmul.mubr.bf16.vlgmr.msra.gmra.mrb[28].mxu1 %v5958_v19 }
 0x239   :  { %4044 = vmatpush1.bf16.msra.mxu1 %v5632_v25  ;;  %4075 = vmatprep.mubr.bf16.mxu1 %v5928_v14 }
 0x23a   :  { %4045 = vmatprep.subr.bf16.mxu1 %v5637_v26 }
 0x23d   :  { %4046 = vmatpush1.bf16.msra.mxu1 %v5635_v27 }
 0x23e   :  { %4047 = vmatprep.subr.bf16.mxu1 %v5640_v28  ;;  %v4091_v28 = vld [vmem:[#allocation8 + $0x8] sm:$0xff] }
 0x23f   :  { %4226 = vmatprep.mubr.f32.mxu0 %v4091_v28 }
 0x241   :  { %4048 = vmatpush1.bf16.msra.mxu1 %v5638_v29  ;;  %v4257_v29 = vld [vmem:[%s6047_s3] sm:$0xff]  ;;  %s5783_s3 = smov [#allocation9]  }
 0x242   :  { %4049 = vmatprep.subr.bf16.mxu1 %v5643_v30  ;;  %v5782_v30 = vmov 0   ;;  %s4275_s28 = sshll.u32 %s5783_s3, 4  ;;  %s4276_s28 = int_to_ptr.vmem [resolvable:$true] %s4275_s28 }
 0x243   :  { %4902 = vset.pattern.permute.xlu0 %v5782_v30  ;;  %s5747_s29 = scalar_lea.vmem %s4276_s28, 256  ;;  %p5752_p11 = scmp.lt.s32.totalorder %s4276_s28, %s4276_s28 }
 0x244   :  { %4260 = vperm.xlu0 %4902, %v4257_v29   ;;  %p5748_p10 = scmp.ne.s32.totalorder %s4276_s28, %s5747_s29  ;;  %p5753_p12 = scmp.lt.s32.totalorder %s5747_s29, %s5747_s29 }
 0x245   :  { %4050 = vmatpush1.bf16.msra.mxu1 %v5641_v49 }
 0x246   :  { %4051 = vmatprep.subr.bf16.mxu1 %v5646_v50  ;;  %p5754_p13 = por %p5753_p12, %p5752_p11 }
 0x248   :  { %p5755_p0 = pnand %p5754_p13, %p5748_p10 }
 0x249   :  { %4052 = vmatpush1.bf16.msra.mxu1 %v5644_v54 }
 0x24a   :  { %4053 = vmatprep.subr.bf16.mxu1 %v5649_v55 }
 0x24b   :  { %v2061_v13 = vpop.f32.mrb[16].mxu1 }
 0x24c   :  { %v6013_v14 = vpop.f32.mrb[16].mxu0  ;;  %v2063_v15 = vpop.f32.mrb[17].mxu1 }
 0x24d   :  { %v6015_v16 = vpop.f32.mrb[17].mxu0  ;;  %v2065_v17 = vpop.f32.mrb[18].mxu1  ;;  %4054 = vmatpush1.bf16.msra.mxu1 %v5647_v5 }
 0x24e   :  { %v6017_v3 = vpop.f32.mrb[18].mxu0  ;;  %v4859_v20 = vpack.c.bf16 %v2065_v17, %v2061_v13  ;;  %v2067_v8 = vpop.f32.mrb[19].mxu1  ;;  %4055 = vmatprep.subr.bf16.mxu1 %v5652_v6 }
 0x24f   :  { %v4871_v22 = vpack.c.bf16 %v6017_v3, %v6013_v14  ;;  %v2823_v35 = vpop.f32.mrb[19].mxu0  ;;  %v4857_v31 = vpack.c.bf16 %v2067_v8, %v2063_v15  ;;  %v4090_v3 = vld [vmem:[#allocation8] sm:$0xff]  ;;  %v4092_v8 = vld [vmem:[#allocation8 + $0x10] sm:$0xff] }
 0x250   :  { %v4869_v37 = vpack.c.bf16 %v2823_v35, %v6015_v16  ;;  %v4097_v35 = vld [vmem:[#allocation8 + $0x38] sm:$0xff] }
 0x251   :  { %4056 = vmatpush1.bf16.msra.mxu1 %v5650_v18  ;;  %4858 = vmatprep.subr.bf16.mxu0 %v4857_v31  ;;  %v4096_v31 = vld [vmem:[#allocation8 + $0x30] sm:$0xff] }
 0x252   :  { %4860 = vmatpush1.bf16.msra.mxu0 %v4859_v20  ;;  %4057 = vmatprep.subr.bf16.mxu1 %v5655_v21  ;;  %v4093_v20 = vld [vmem:[#allocation8 + $0x18] sm:$0xff]  ;;  %v4095_v21 = vld [vmem:[#allocation8 + $0x28] sm:$0xff] }
 0x253   :  { %4862 = vmatprep.subr.bf16.mxu0 %v4861_v9 }
 0x255   :  { %4058 = vmatpush1.bf16.msra.mxu1 %v5653_v39 }
 0x256   :  { %4059 = vmatprep.subr.bf16.mxu1 %v5658_v36  ;;  %4864 = vmatpush1.bf16.msra.mxu0 %v4863_v59  ;;  %v5679_v59 = vld [vmem:[#allocation6 + $0xff4] ss:$8 sps:$4 sm:$0xff]  }
 0x259   :  { %4060 = vmatpush1.bf16.msra.mxu1 %v5656_v34 }
 0x25a   :  { %4061 = vmatprep.subr.bf16.mxu1 %v5661_v38 }
 0x25d   :  { %4062 = vmatpush1.bf16.msra.mxu1 %v5659_v40 }
 0x25e   :  { %4063 = vmatprep.subr.bf16.mxu1 %v5664_v43 }
 0x261   :  { %4064 = vmatpush1.bf16.msra.mxu1 %v5662_v45 }
 0x262   :  { %4065 = vmatprep.subr.bf16.mxu1 %v5667_v58 }
 0x265   :  { %4066 = vmatpush1.bf16.msra.mxu1 %v5665_v60 }
 0x266   :  { %4067 = vmatprep.subr.bf16.mxu1 %v5670_v46 }
 0x269   :  { %4068 = vmatpush1.bf16.msra.mxu1 %v5668_v62 }
 0x26a   :  { %4069 = vmatprep.subr.bf16.mxu1 %v5673_v2 }
 0x26d   :  { %4070 = vmatpush1.bf16.msra.mxu1 %v5671_v4 }
 0x26e   :  { %4071 = vmatprep.subr.bf16.mxu1 %v5676_v44 }
 0x271   :  { %4072 = vmatpush1.bf16.msra.mxu1 %v5674_v61 }
 0x272   :  { %4073 = vmatprep.subr.bf16.mxu1 %v5679_v59 }
 0x275   :  { %4074 = vmatpush1.bf16.msra.mxu1 %v5677_v1 }
 0x278   :  { %4076 = vmatmul.mubr.bf16.vlgmr.msra.gmra.mrb[32].mxu1 %v5958_v19 }
 0x28b   :  { %v2565_v7 = vpop.f32.mrb[20].mxu1 }
 0x28c   :  { %v3321_v9 = vpop.f32.mrb[20].mxu0  ;;  %v2567_v10 = vpop.f32.mrb[21].mxu1 }
 0x28d   :  { %v3323_v12 = vpop.f32.mrb[21].mxu0  ;;  %v2569_v32 = vpop.f32.mrb[22].mxu1 }
 0x28e   :  { %v3325_v41 = vpop.f32.mrb[22].mxu0  ;;  %v4867_v47 = vpack.c.bf16 %v2569_v32, %v2565_v7  ;;  %v2571_v52 = vpop.f32.mrb[23].mxu1 }
 0x28f   :  { %v4879_v53 = vpack.c.bf16 %v3325_v41, %v3321_v9  ;;  %v3327_v63 = vpop.f32.mrb[23].mxu0  ;;  %v4865_v23 = vpack.c.bf16 %v2571_v52, %v2567_v10 }
 0x290   :  { %v4877_v42 = vpack.c.bf16 %v3327_v63, %v3323_v12 }
 0x291   :  { %4866 = vmatprep.subr.bf16.mxu0 %v4865_v23 }
 0x292   :  { %4868 = vmatpush1.bf16.msra.mxu0 %v4867_v47 }
 0x293   :  { %4870 = vmatprep.subr.bf16.mxu0 %v4869_v37 }
 0x296   :  { %4872 = vmatpush1.bf16.msra.mxu0 %v4871_v22  ;;  %v4094_v22 = vld [vmem:[#allocation8 + $0x20] sm:$0xff] }
 0x2c3   :  { %v4261_v62 = vpop.permute.xlu0 %4260 }
 0x2cb   :  { %v3069_v57 = vpop.f32.mrb[24].mxu1 }
 0x2cc   :  { %v3825_v0 = vpop.f32.mrb[24].mxu0  ;;  %v3071_v48 = vpop.f32.mrb[25].mxu1 }
 0x2cd   :  { %v3827_v19 = vpop.f32.mrb[25].mxu0  ;;  %v3073_v33 = vpop.f32.mrb[26].mxu1 }
 0x2ce   :  { %v3829_v51 = vpop.f32.mrb[26].mxu0  ;;  %v4875_v56 = vpack.c.bf16 %v3073_v33, %v3069_v57  ;;  %v3075_v24 = vpop.f32.mrb[27].mxu1 }
 0x2cf   :  { %v4887_v11 = vpack.c.bf16 %v3829_v51, %v3825_v0  ;;  %v3831_v25 = vpop.f32.mrb[27].mxu0  ;;  %v4873_v26 = vpack.c.bf16 %v3075_v24, %v3071_v48 }
 0x2d0   :  { %v4885_v27 = vpack.c.bf16 %v3831_v25, %v3827_v19 }
 0x2d1   :  { %4874 = vmatprep.subr.bf16.mxu0 %v4873_v26 }
 0x2d2   :  { %4876 = vmatpush1.bf16.msra.mxu0 %v4875_v56 }
 0x2d3   :  { %4878 = vmatprep.subr.bf16.mxu0 %v4877_v42 }
 0x2d6   :  { %4880 = vmatpush1.bf16.msra.mxu0 %v4879_v53 }
 0x30b   :  { %v3573_v49 = vpop.f32.mrb[28].mxu1 }
 0x30c   :  { %v3575_v50 = vpop.f32.mrb[29].mxu1 }
 0x30d   :  { %v3577_v54 = vpop.f32.mrb[30].mxu1 }
 0x30e   :  { %v4883_v55 = vpack.c.bf16 %v3577_v54, %v3573_v49  ;;  %v3579_v5 = vpop.f32.mrb[31].mxu1 }
 0x30f   :  { %v4881_v6 = vpack.c.bf16 %v3579_v5, %v3575_v50 }
 0x311   :  { %4882 = vmatprep.subr.bf16.mxu0 %v4881_v6 }
 0x312   :  { %4884 = vmatpush1.bf16.msra.mxu0 %v4883_v55 }
 0x313   :  { %4886 = vmatprep.subr.bf16.mxu0 %v4885_v27 }
 0x316   :  { %4888 = vmatpush1.bf16.msra.mxu0 %v4887_v11 }
 0x34b   :  { %v4077_v13 = vpop.f32.mrb[32].mxu1 }
 0x34c   :  { %v4079_v14 = vpop.f32.mrb[33].mxu1 }
 0x34d   :  { %v4081_v15 = vpop.f32.mrb[34].mxu1 }
 0x34e   :  { %v4891_v16 = vpack.c.bf16 %v4081_v15, %v4077_v13  ;;  %v4083_v17 = vpop.f32.mrb[35].mxu1 }
 0x34f   :  { %v4889_v18 = vpack.c.bf16 %v4083_v17, %v4079_v14 }
 0x351   :  { %4890 = vmatprep.subr.bf16.mxu0 %v4889_v18 }
 0x352   :  { %4892 = vmatpush1.bf16.msra.mxu0 %v4891_v16 }
 0x355   :  { %4227 = vmatmul.mubr.f32.vlgmr.msra.gmra.mrb[28].mxu0 %v4090_v3 }
 0x356   :  { %4232 = vmatprep.mubr.f32.mxu0 %v4093_v20 }
 0x359   :  { %4233 = vmatmul.mubr.f32.gmra.mrb[30].mxu0 %v4092_v8 }
 0x35a   :  { %4238 = vmatprep.mubr.f32.mxu0 %v4095_v21 }
 0x35d   :  { %4239 = vmatmul.mubr.f32.gmra.mrb[32].mxu0 %v4094_v22 }
 0x35e   :  { %4244 = vmatprep.mubr.f32.mxu0 %v4097_v35 }
 0x361   :  { %4245 = vmatmul.mubr.f32.gmra.mrb[34].mxu0 %v4096_v31 }
 0x428   :  { %v4228_v37 = vpop.f32.mrb[28].mxu0 }
 0x429   :  { %v4230_v39 = vpop.f32.mrb[29].mxu0 }
 0x42c   :  { %v4234_v36 = vpop.f32.mrb[30].mxu0 }
 0x42d   :  { %v4251_v34 = vmax.f32 %v4228_v37, %v4234_v36  ;;  %v4236_v38 = vpop.f32.mrb[31].mxu0 }
 0x42e   :  { %v4252_v40 = vmax.f32 %v4230_v39, %v4236_v38 }
 0x430   :  { %v4240_v43 = vpop.f32.mrb[32].mxu0 }
 0x431   :  { %v4253_v45 = vmax.f32 %v4251_v34, %v4240_v43  ;;  %v4242_v58 = vpop.f32.mrb[33].mxu0 }
 0x432   :  { %v4254_v60 = vmax.f32 %v4252_v40, %v4242_v58 }
 0x434   :  { %v4246_v46 = vpop.f32.mrb[34].mxu0 }
 0x435   :  { %v4255_v2 = vmax.f32 %v4253_v45, %v4246_v46  ;;  %v4248_v4 = vpop.f32.mrb[35].mxu0 }
 0x436   :  { %v4256_v44 = vmax.f32 %v4254_v60, %v4248_v4 }
 0x437   :  { %v4263_v61 = vadd.f32 %v4261_v62, %v4255_v2 }
 0x438   :  { %v4264_v59 = vadd.f32 %v4261_v62, %v4256_v44 }
 0x439   :  { %v4265_v1 = vmax.f32 %v4263_v61, 0.0 }
 0x43a   :  { %v4266_v7 = vmax.f32 %v4264_v59, 0.0 }
 0x43b   :  { %4267 = vst [vmem:[#allocation9] sm:$0xff] %v4265_v1 }
 0x43c   :  { %4268 = vst [vmem:[#allocation9 + $0x8] sm:$0xff] %v4266_v7 }
 0x43d   :  { %5758 = shalt.err (!%p5755_p0)
}
 0x43e   :  { %s5759_s6 = scalar_lea.hbm %s6048_s4, 256 }
 0x43f   :  { %p5760_p1 = scmp.ne.s32.totalorder %s6048_s4, %s5759_s6  ;;  %p5763_p2 = scmp.lt.u32.totalorder %s5759_s6, %s6048_s4 }
 0x441   :  { %p5765_p3 = pnand %p5763_p2, %p5760_p1 }
 0x443   :  { %5768 = shalt.err (!%p5765_p3)
}
 0x444   :  { %4278 = dma.vmem_to_hbm [thread:$0]  %s4276_s28, 256, %s6048_s4, [#allocation5]  }
 0x445   :  { %5773 = dma.done.wait [#allocation5], 256  }
 0x446   :  { %5774 = vsyncadd [#allocation5], 4294967040 }
 0x447   :  { %4282 = vsyncpa [#allocation4], 1 }
 0x448   :  { %4283 = vsyncpa [#allocation7], 1 }
 0x449   :  { %4284 = vsyncpa [#allocation5], 1 }

</bundles_post_ra>
